<compile_context>
chip_gen: v5e
topology: v5e:2x2
jax: 0.10.0
libtpu: 0.0.40
codegen_flags: <defaults>
</compile_context>

<pallas_src>
import math
import jax
import jax.numpy as jnp
from jax.experimental import pallas as pl
from jax.experimental.pallas import tpu as pltpu

# ----- small synthetic BERT config -----
BATCH = 2
SEQ = 8
HIDDEN = 32
HEADS = 4
HEAD_DIM = HIDDEN // HEADS
INTER = 64
LAYERS = 2
VOCAB = 100
TYPE_VOCAB = 2
MAX_POS = 16
OUT_DIM = 2          # start / end logits
OUT_PAD = 128        # lane-dense padded output width
LN_EPS = 1e-12

# ----- packed weight-slab layout (rows per layer, lane width) -----
W_ROWS = 3 * HIDDEN + INTER          # 160 rows per layer
WSLAB_LANES = 3 * HIDDEN             # 96 lanes
QKV_R, WO_R, WI_R, WF_R = 0, HIDDEN, 2 * HIDDEN, 3 * HIDDEN   # row offsets (8-aligned)

# ----- packed vector/param slab layout (rows, 128 lanes each) -----
EMB_G_ROW, EMB_B_ROW = 0, 1
LAYER_VEC_BASE = 2                   # 8 rows per layer: bqkv, bo, g1, b1, bi, bf, g2, b2
OUTB_ROW = LAYER_VEC_BASE + LAYERS * 8        # row 18: span-head bias (lanes 0:2)
OUTW_ROW = 24                                 # rows 24:56: span-head weight (8-aligned)
P_ROWS = OUTW_ROW + HIDDEN                    # 56


# ---------------- in-kernel helpers ----------------
def _layernorm(x, gamma, beta):
    mean = jnp.mean(x, axis=-1, keepdims=True)
    var = jnp.mean(jnp.square(x - mean), axis=-1, keepdims=True)
    inv = jax.lax.rsqrt(var + LN_EPS)
    return (x - mean) * inv * gamma + beta


def _gelu(x):
    # TODO(synk): HF BERT uses exact erf-GELU; tanh approximation used here.
    c = math.sqrt(2.0 / math.pi)
    return 0.5 * x * (1.0 + jnp.tanh(c * (x + 0.044715 * x * x * x)))


# ---------------- fused forward kernel (one batch element per grid step) ----------------
def fused_forward_kernel(act_ref, w_ref, p_ref, o_ref):
    # act_ref: (2*SEQ, HIDDEN)  rows 0:SEQ embeddings, rows SEQ:2*SEQ additive mask
    # w_ref:   (LAYERS*W_ROWS, WSLAB_LANES)  packed per-layer matrices
    # p_ref:   (P_ROWS, 128)    packed LN/bias vectors + span-head weight/bias
    # o_ref:   (SEQ, OUT_PAD)   lane-dense padded span logits
    emb_g = p_ref[EMB_G_ROW:EMB_G_ROW + 1, 0:HIDDEN]
    emb_b = p_ref[EMB_B_ROW:EMB_B_ROW + 1, 0:HIDDEN]

    # embedding LayerNorm (dropout = identity at inference)
    x = _layernorm(act_ref[0:SEQ, :], emb_g, emb_b)          # (SEQ, HIDDEN)
    mask = act_ref[SEQ:2 * SEQ, 0:SEQ]                       # (SEQ, SEQ) additive mask

    scale = 1.0 / math.sqrt(HEAD_DIM)

    for l in range(LAYERS):                                  # static unroll
        r0 = l * W_ROWS
        wqkv = w_ref[r0 + QKV_R:r0 + QKV_R + HIDDEN, 0:3 * HIDDEN]   # (H, 3H)
        wo = w_ref[r0 + WO_R:r0 + WO_R + HIDDEN, 0:HIDDEN]           # (H, H)
        wi = w_ref[r0 + WI_R:r0 + WI_R + HIDDEN, 0:INTER]            # (H, I)
        wf = w_ref[r0 + WF_R:r0 + WF_R + INTER, 0:HIDDEN]            # (I, H)

        base = LAYER_VEC_BASE + l * 8
        bqkv = p_ref[base + 0:base + 1, 0:3 * HIDDEN]
        bo = p_ref[base + 1:base + 2, 0:HIDDEN]
        g1 = p_ref[base + 2:base + 3, 0:HIDDEN]
        b1 = p_ref[base + 3:base + 4, 0:HIDDEN]
        bi = p_ref[base + 4:base + 5, 0:INTER]
        bf = p_ref[base + 5:base + 6, 0:HIDDEN]
        g2 = p_ref[base + 6:base + 7, 0:HIDDEN]
        b2 = p_ref[base + 7:base + 8, 0:HIDDEN]

        # fused QKV projection: one (SEQ, H) x (H, 3H) matmul, no reshape
        qkv = jnp.dot(x, wqkv, preferred_element_type=jnp.float32) + bqkv
        q = qkv[:, 0:HIDDEN]
        k = qkv[:, HIDDEN:2 * HIDDEN]
        v = qkv[:, 2 * HIDDEN:3 * HIDDEN]

        # per-head attention; context folded straight into the output projection
        # (no VMEM scratch, no lane concat, no relayout).
        attn = jnp.zeros((SEQ, HIDDEN), jnp.float32)
        for h in range(HEADS):                               # static unroll
            sl = slice(h * HEAD_DIM, (h + 1) * HEAD_DIM)
            qh, kh, vh = q[:, sl], k[:, sl], v[:, sl]
            s = jnp.dot(qh, kh.T, preferred_element_type=jnp.float32) * scale + mask
            m = jnp.max(s, axis=-1, keepdims=True)
            p = jnp.exp(s - m)
            p = p * pl.reciprocal(jnp.sum(p, axis=-1, keepdims=True), approx=True)
            ctx = jnp.dot(p, vh, preferred_element_type=jnp.float32)       # (SEQ, HD)
            attn = attn + jnp.dot(ctx, wo[sl, :], preferred_element_type=jnp.float32)

        x1 = _layernorm(x + attn + bo, g1, b1)
        hid = _gelu(jnp.dot(x1, wi, preferred_element_type=jnp.float32) + bi)
        ffn = jnp.dot(hid, wf, preferred_element_type=jnp.float32) + bf
        x = _layernorm(x1 + ffn, g2, b2)

    # fused span head: lane-dense (SEQ, 128) padded logits (cols >= 2 are zero)
    out_w = p_ref[OUTW_ROW:OUTW_ROW + HIDDEN, :]             # (H, 128)
    out_b = p_ref[OUTB_ROW:OUTB_ROW + 1, :]                  # (1, 128)
    o_ref[...] = jnp.dot(x, out_w, preferred_element_type=jnp.float32) + out_b


# ---------------- parameter init (deterministic, pre-packed slabs) ----------------
def init_params(key):
    def nrm(k, shape, scale=0.02):
        return (scale * jax.random.normal(k, shape)).astype(jnp.float32)

    keys = iter(jax.random.split(key, 12))

    word_emb = nrm(next(keys), (VOCAB, HIDDEN))
    pos_emb = nrm(next(keys), (MAX_POS, HIDDEN))
    type_emb = nrm(next(keys), (TYPE_VOCAB, HIDDEN))

    wslab = jnp.zeros((LAYERS * W_ROWS, WSLAB_LANES), jnp.float32)
    pslab = jnp.zeros((P_ROWS, OUT_PAD), jnp.float32)

    # embedding LayerNorm: gamma=1 (row 0), beta=0 (row 1 stays zero)
    pslab = pslab.at[EMB_G_ROW, :HIDDEN].set(1.0)

    for l in range(LAYERS):
        r0 = l * W_ROWS
        wslab = wslab.at[r0 + QKV_R:r0 + QKV_R + HIDDEN, :3 * HIDDEN].set(
            nrm(next(keys), (HIDDEN, 3 * HIDDEN)))
        wslab = wslab.at[r0 + WO_R:r0 + WO_R + HIDDEN, :HIDDEN].set(
            nrm(next(keys), (HIDDEN, HIDDEN)))
        wslab = wslab.at[r0 + WI_R:r0 + WI_R + HIDDEN, :INTER].set(
            nrm(next(keys), (HIDDEN, INTER)))
        wslab = wslab.at[r0 + WF_R:r0 + WF_R + INTER, :HIDDEN].set(
            nrm(next(keys), (INTER, HIDDEN)))

        base = LAYER_VEC_BASE + l * 8
        # biases (bqkv, bo, bi, bf) stay zero; LN gammas = 1
        pslab = pslab.at[base + 2, :HIDDEN].set(1.0)   # ln1 gamma
        pslab = pslab.at[base + 6, :HIDDEN].set(1.0)   # ln2 gamma

    # span head: weight rows 24:56, bias row 18 (stays zero); lane-dense padded
    pslab = pslab.at[OUTW_ROW:OUTW_ROW + HIDDEN, :OUT_DIM].set(
        nrm(next(keys), (HIDDEN, OUT_DIM)))

    return {"word_emb": word_emb, "pos_emb": pos_emb, "type_emb": type_emb,
            "wslab": wslab, "pslab": pslab}


# ---------------- full forward (TweetExtraction.forward) ----------------
def tweet_extraction_forward(params, input_ids, attention_mask, token_type_ids):
    B, S = input_ids.shape

    # --- embeddings (gather glue in plain JAX) ---
    pos_ids = jnp.arange(S)[None, :]
    emb = (jnp.take(params["word_emb"], input_ids, axis=0)
           + jnp.take(params["pos_emb"], pos_ids, axis=0)
           + jnp.take(params["type_emb"], token_type_ids, axis=0)).astype(jnp.float32)

    # additive attention mask: (1 - mask) * -10000, broadcast over query rows
    add_mask = (1.0 - attention_mask.astype(jnp.float32)) * -10000.0           # (B, S)
    mask3 = jnp.broadcast_to(add_mask[:, None, :], (B, S, S))                  # (B, S, S)
    mask_pad = jnp.zeros((B, S, HIDDEN), jnp.float32).at[:, :, :S].set(mask3)

    # single packed activation slab: rows 0:S embeddings, rows S:2S mask
    act_in = jnp.concatenate([emb, mask_pad], axis=1)                          # (B, 2S, H)

    logits_pad = pl.pallas_call(
        fused_forward_kernel,
        out_shape=jax.ShapeDtypeStruct((B, S, OUT_PAD), jnp.float32),
        grid=(B,),
        in_specs=[
            pl.BlockSpec((None, 2 * S, HIDDEN), lambda b: (b, 0, 0)),
            pl.BlockSpec((LAYERS * W_ROWS, WSLAB_LANES), lambda b: (0, 0)),
            pl.BlockSpec((P_ROWS, OUT_PAD), lambda b: (0, 0)),
        ],
        out_specs=pl.BlockSpec((None, S, OUT_PAD), lambda b: (b, 0, 0)),
        compiler_params=pltpu.CompilerParams(dimension_semantics=("parallel",)),
    )(act_in, params["wslab"], params["pslab"])

    start_logits = logits_pad[..., 0]      # split(1, dim=-1) + squeeze(-1)
    end_logits = logits_pad[..., 1]
    return start_logits, end_logits


if __name__ == "__main__":
    key = jax.random.PRNGKey(0)
    kp, ki, kt = jax.random.split(key, 3)

    params = init_params(kp)

    input_ids = jax.random.randint(ki, (BATCH, SEQ), 0, VOCAB, dtype=jnp.int32)
    token_type_ids = jax.random.randint(kt, (BATCH, SEQ), 0, TYPE_VOCAB, dtype=jnp.int32)
    attention_mask = jnp.ones((BATCH, SEQ), jnp.int32).at[1, SEQ - 2:].set(0)

    start_logits, end_logits = tweet_extraction_forward(
        params, input_ids, attention_mask, token_type_ids)
    jax.block_until_ready((start_logits, end_logits))

    assert start_logits.shape == (BATCH, SEQ)
    assert end_logits.shape == (BATCH, SEQ)
    print("KERNEL_OK")
</pallas_src>

<mosaic_0001>
module attributes {stable_mosaic.version = 11 : i64} {
  func.func @fused_forward_kernel(%arg0: i32, %arg1: memref<1x16x32xf32, #tpu.memory_space<vmem>>, %arg2: memref<320x96xf32, #tpu.memory_space<vmem>>, %arg3: memref<56x128xf32, #tpu.memory_space<vmem>>, %arg4: memref<1x8x128xf32, #tpu.memory_space<vmem>>) attributes {dimension_semantics = [#tpu.dimension_semantics<parallel>], iteration_bounds = array<i64: 2>, scalar_prefetch = 0 : i64, scratch_operands = 0 : i64, tpu.core_type = #tpu.core_type<tc>, window_params = [{transform_indices = @transform_0, window_bounds = array<i64: 1, 16, 32>}, {pipeline_mode = #tpu.pipeline_mode<synchronous>, transform_indices = @transform_1, window_bounds = array<i64: 320, 96>}, {pipeline_mode = #tpu.pipeline_mode<synchronous>, transform_indices = @transform_2, window_bounds = array<i64: 56, 128>}, {transform_indices = @transform_3, window_bounds = array<i64: 1, 8, 128>}]} {
    %c0 = arith.constant 0 : index
    %c0_0 = arith.constant 0 : index
    %0 = vector.load %arg3[%c0, %c0_0] : memref<56x128xf32, #tpu.memory_space<vmem>>, vector<1x32xf32>
    %c1 = arith.constant 1 : index
    %c0_1 = arith.constant 0 : index
    %1 = vector.load %arg3[%c1, %c0_1] : memref<56x128xf32, #tpu.memory_space<vmem>>, vector<1x32xf32>
    %c0_2 = arith.constant 0 : index
    %c0_3 = arith.constant 0 : index
    %c0_4 = arith.constant 0 : index
    %2 = vector.load %arg1[%c0_2, %c0_3, %c0_4] : memref<1x16x32xf32, #tpu.memory_space<vmem>>, vector<1x8x32xf32>
    %3 = vector.shape_cast %2 : vector<1x8x32xf32> to vector<8x32xf32>
    %cst = arith.constant dense<0.000000e+00> : vector<8xf32>
    %4 = vector.multi_reduction <add>, %3, %cst [1] : vector<8x32xf32> to vector<8xf32>
    %5 = vector.shape_cast %4 : vector<8xf32> to vector<8x1xf32>
    %cst_5 = arith.constant 3.200000e+01 : f32
    %6 = vector.broadcast %cst_5 : f32 to vector<8x1xf32>
    %7 = arith.divf %5, %6 : vector<8x1xf32>
    %8 = vector.broadcast %7 : vector<8x1xf32> to vector<8x32xf32>
    %9 = arith.subf %3, %8 : vector<8x32xf32>
    %10 = arith.mulf %9, %9 : vector<8x32xf32>
    %cst_6 = arith.constant dense<0.000000e+00> : vector<8xf32>
    %11 = vector.multi_reduction <add>, %10, %cst_6 [1] : vector<8x32xf32> to vector<8xf32>
    %12 = vector.shape_cast %11 : vector<8xf32> to vector<8x1xf32>
    %cst_7 = arith.constant 3.200000e+01 : f32
    %13 = vector.broadcast %cst_7 : f32 to vector<8x1xf32>
    %14 = arith.divf %12, %13 : vector<8x1xf32>
    %cst_8 = arith.constant 9.99999996E-13 : f32
    %15 = vector.broadcast %cst_8 : f32 to vector<8x1xf32>
    %16 = arith.addf %14, %15 : vector<8x1xf32>
    %17 = math.rsqrt %16 : vector<8x1xf32>
    %18 = vector.broadcast %7 : vector<8x1xf32> to vector<8x32xf32>
    %19 = arith.subf %3, %18 : vector<8x32xf32>
    %20 = vector.broadcast %17 : vector<8x1xf32> to vector<8x32xf32>
    %21 = arith.mulf %19, %20 : vector<8x32xf32>
    %22 = vector.broadcast %0 : vector<1x32xf32> to vector<8x32xf32>
    %23 = arith.mulf %21, %22 : vector<8x32xf32>
    %24 = vector.broadcast %1 : vector<1x32xf32> to vector<8x32xf32>
    %25 = arith.addf %23, %24 : vector<8x32xf32>
    %c0_9 = arith.constant 0 : index
    %c8 = arith.constant 8 : index
    %c0_10 = arith.constant 0 : index
    %26 = vector.load %arg1[%c0_9, %c8, %c0_10] : memref<1x16x32xf32, #tpu.memory_space<vmem>>, vector<1x8x8xf32>
    %27 = vector.shape_cast %26 : vector<1x8x8xf32> to vector<8x8xf32>
    %c0_11 = arith.constant 0 : index
    %c0_12 = arith.constant 0 : index
    %28 = vector.load %arg2[%c0_11, %c0_12] : memref<320x96xf32, #tpu.memory_space<vmem>>, vector<32x96xf32>
    %c32 = arith.constant 32 : index
    %c0_13 = arith.constant 0 : index
    %29 = vector.load %arg2[%c32, %c0_13] : memref<320x96xf32, #tpu.memory_space<vmem>>, vector<32x32xf32>
    %c64 = arith.constant 64 : index
    %c0_14 = arith.constant 0 : index
    %30 = vector.load %arg2[%c64, %c0_14] : memref<320x96xf32, #tpu.memory_space<vmem>>, vector<32x64xf32>
    %c96 = arith.constant 96 : index
    %c0_15 = arith.constant 0 : index
    %31 = vector.load %arg2[%c96, %c0_15] : memref<320x96xf32, #tpu.memory_space<vmem>>, vector<64x32xf32>
    %c2 = arith.constant 2 : index
    %c0_16 = arith.constant 0 : index
    %32 = vector.load %arg3[%c2, %c0_16] : memref<56x128xf32, #tpu.memory_space<vmem>>, vector<1x96xf32>
    %c3 = arith.constant 3 : index
    %c0_17 = arith.constant 0 : index
    %33 = vector.load %arg3[%c3, %c0_17] : memref<56x128xf32, #tpu.memory_space<vmem>>, vector<1x32xf32>
    %c4 = arith.constant 4 : index
    %c0_18 = arith.constant 0 : index
    %34 = vector.load %arg3[%c4, %c0_18] : memref<56x128xf32, #tpu.memory_space<vmem>>, vector<1x32xf32>
    %c5 = arith.constant 5 : index
    %c0_19 = arith.constant 0 : index
    %35 = vector.load %arg3[%c5, %c0_19] : memref<56x128xf32, #tpu.memory_space<vmem>>, vector<1x32xf32>
    %c6 = arith.constant 6 : index
    %c0_20 = arith.constant 0 : index
    %36 = vector.load %arg3[%c6, %c0_20] : memref<56x128xf32, #tpu.memory_space<vmem>>, vector<1x64xf32>
    %c7 = arith.constant 7 : index
    %c0_21 = arith.constant 0 : index
    %37 = vector.load %arg3[%c7, %c0_21] : memref<56x128xf32, #tpu.memory_space<vmem>>, vector<1x32xf32>
    %c8_22 = arith.constant 8 : index
    %c0_23 = arith.constant 0 : index
    %38 = vector.load %arg3[%c8_22, %c0_23] : memref<56x128xf32, #tpu.memory_space<vmem>>, vector<1x32xf32>
    %c9 = arith.constant 9 : index
    %c0_24 = arith.constant 0 : index
    %39 = vector.load %arg3[%c9, %c0_24] : memref<56x128xf32, #tpu.memory_space<vmem>>, vector<1x32xf32>
    %cst_25 = arith.constant dense<0.000000e+00> : vector<8x96xf32>
    %40 = tpu.matmul %25, %28, %cst_25 {dimension_numbers = #tpu.dot_dimension_numbers<[1], [0], [0], [1], [0, 0, 1, 1], [], []>} : vector<8x32xf32>, vector<32x96xf32>, vector<8x96xf32> -> vector<8x96xf32>
    %41 = vector.broadcast %32 : vector<1x96xf32> to vector<8x96xf32>
    %42 = arith.addf %40, %41 : vector<8x96xf32>
    %43 = vector.extract_strided_slice %42 {offsets = [0, 0], sizes = [8, 32], strides = [1, 1]} : vector<8x96xf32> to vector<8x32xf32>
    %44 = vector.extract_strided_slice %42 {offsets = [0, 32], sizes = [8, 32], strides = [1, 1]} : vector<8x96xf32> to vector<8x32xf32>
    %45 = vector.extract_strided_slice %42 {offsets = [0, 64], sizes = [8, 32], strides = [1, 1]} : vector<8x96xf32> to vector<8x32xf32>
    %cst_26 = arith.constant 0.000000e+00 : f32
    %46 = vector.broadcast %cst_26 : f32 to vector<8x32xf32>
    %47 = vector.extract_strided_slice %43 {offsets = [0, 0], sizes = [8, 8], strides = [1, 1]} : vector<8x32xf32> to vector<8x8xf32>
    %48 = vector.extract_strided_slice %44 {offsets = [0, 0], sizes = [8, 8], strides = [1, 1]} : vector<8x32xf32> to vector<8x8xf32>
    %49 = vector.extract_strided_slice %45 {offsets = [0, 0], sizes = [8, 8], strides = [1, 1]} : vector<8x32xf32> to vector<8x8xf32>
    %50 = tpu.transpose %48, [1, 0] : vector<8x8xf32> -> vector<8x8xf32>
    %cst_27 = arith.constant dense<0.000000e+00> : vector<8x8xf32>
    %51 = tpu.matmul %47, %50, %cst_27 {dimension_numbers = #tpu.dot_dimension_numbers<[1], [0], [0], [1], [0, 0, 1, 1], [], []>} : vector<8x8xf32>, vector<8x8xf32>, vector<8x8xf32> -> vector<8x8xf32>
    %cst_28 = arith.constant 0.353553385 : f32
    %52 = vector.broadcast %cst_28 : f32 to vector<8x8xf32>
    %53 = arith.mulf %51, %52 : vector<8x8xf32>
    %54 = arith.addf %53, %27 : vector<8x8xf32>
    %cst_29 = arith.constant dense<0xFF800000> : vector<8xf32>
    %55 = vector.multi_reduction <maximumf>, %54, %cst_29 [1] : vector<8x8xf32> to vector<8xf32>
    %56 = vector.shape_cast %55 : vector<8xf32> to vector<8x1xf32>
    %57 = vector.broadcast %56 : vector<8x1xf32> to vector<8x8xf32>
    %58 = arith.subf %54, %57 : vector<8x8xf32>
    %59 = math.exp %58 : vector<8x8xf32>
    %cst_30 = arith.constant dense<0.000000e+00> : vector<8xf32>
    %60 = vector.multi_reduction <add>, %59, %cst_30 [1] : vector<8x8xf32> to vector<8xf32>
    %61 = vector.shape_cast %60 : vector<8xf32> to vector<8x1xf32>
    %62 = tpu.reciprocal %61 {approx = true} : vector<8x1xf32> -> vector<8x1xf32>
    %63 = vector.broadcast %62 : vector<8x1xf32> to vector<8x8xf32>
    %64 = arith.mulf %59, %63 : vector<8x8xf32>
    %cst_31 = arith.constant dense<0.000000e+00> : vector<8x8xf32>
    %65 = tpu.matmul %64, %49, %cst_31 {dimension_numbers = #tpu.dot_dimension_numbers<[1], [0], [0], [1], [0, 0, 1, 1], [], []>} : vector<8x8xf32>, vector<8x8xf32>, vector<8x8xf32> -> vector<8x8xf32>
    %66 = vector.extract_strided_slice %29 {offsets = [0, 0], sizes = [8, 32], strides = [1, 1]} : vector<32x32xf32> to vector<8x32xf32>
    %cst_32 = arith.constant dense<0.000000e+00> : vector<8x32xf32>
    %67 = tpu.matmul %65, %66, %cst_32 {dimension_numbers = #tpu.dot_dimension_numbers<[1], [0], [0], [1], [0, 0, 1, 1], [], []>} : vector<8x8xf32>, vector<8x32xf32>, vector<8x32xf32> -> vector<8x32xf32>
    %68 = arith.addf %46, %67 : vector<8x32xf32>
    %69 = vector.extract_strided_slice %43 {offsets = [0, 8], sizes = [8, 8], strides = [1, 1]} : vector<8x32xf32> to vector<8x8xf32>
    %70 = vector.extract_strided_slice %44 {offsets = [0, 8], sizes = [8, 8], strides = [1, 1]} : vector<8x32xf32> to vector<8x8xf32>
    %71 = vector.extract_strided_slice %45 {offsets = [0, 8], sizes = [8, 8], strides = [1, 1]} : vector<8x32xf32> to vector<8x8xf32>
    %72 = tpu.transpose %70, [1, 0] : vector<8x8xf32> -> vector<8x8xf32>
    %cst_33 = arith.constant dense<0.000000e+00> : vector<8x8xf32>
    %73 = tpu.matmul %69, %72, %cst_33 {dimension_numbers = #tpu.dot_dimension_numbers<[1], [0], [0], [1], [0, 0, 1, 1], [], []>} : vector<8x8xf32>, vector<8x8xf32>, vector<8x8xf32> -> vector<8x8xf32>
    %cst_34 = arith.constant 0.353553385 : f32
    %74 = vector.broadcast %cst_34 : f32 to vector<8x8xf32>
    %75 = arith.mulf %73, %74 : vector<8x8xf32>
    %76 = arith.addf %75, %27 : vector<8x8xf32>
    %cst_35 = arith.constant dense<0xFF800000> : vector<8xf32>
    %77 = vector.multi_reduction <maximumf>, %76, %cst_35 [1] : vector<8x8xf32> to vector<8xf32>
    %78 = vector.shape_cast %77 : vector<8xf32> to vector<8x1xf32>
    %79 = vector.broadcast %78 : vector<8x1xf32> to vector<8x8xf32>
    %80 = arith.subf %76, %79 : vector<8x8xf32>
    %81 = math.exp %80 : vector<8x8xf32>
    %cst_36 = arith.constant dense<0.000000e+00> : vector<8xf32>
    %82 = vector.multi_reduction <add>, %81, %cst_36 [1] : vector<8x8xf32> to vector<8xf32>
    %83 = vector.shape_cast %82 : vector<8xf32> to vector<8x1xf32>
    %84 = tpu.reciprocal %83 {approx = true} : vector<8x1xf32> -> vector<8x1xf32>
    %85 = vector.broadcast %84 : vector<8x1xf32> to vector<8x8xf32>
    %86 = arith.mulf %81, %85 : vector<8x8xf32>
    %cst_37 = arith.constant dense<0.000000e+00> : vector<8x8xf32>
    %87 = tpu.matmul %86, %71, %cst_37 {dimension_numbers = #tpu.dot_dimension_numbers<[1], [0], [0], [1], [0, 0, 1, 1], [], []>} : vector<8x8xf32>, vector<8x8xf32>, vector<8x8xf32> -> vector<8x8xf32>
    %88 = vector.extract_strided_slice %29 {offsets = [8, 0], sizes = [8, 32], strides = [1, 1]} : vector<32x32xf32> to vector<8x32xf32>
    %cst_38 = arith.constant dense<0.000000e+00> : vector<8x32xf32>
    %89 = tpu.matmul %87, %88, %cst_38 {dimension_numbers = #tpu.dot_dimension_numbers<[1], [0], [0], [1], [0, 0, 1, 1], [], []>} : vector<8x8xf32>, vector<8x32xf32>, vector<8x32xf32> -> vector<8x32xf32>
    %90 = arith.addf %68, %89 : vector<8x32xf32>
    %91 = vector.extract_strided_slice %43 {offsets = [0, 16], sizes = [8, 8], strides = [1, 1]} : vector<8x32xf32> to vector<8x8xf32>
    %92 = vector.extract_strided_slice %44 {offsets = [0, 16], sizes = [8, 8], strides = [1, 1]} : vector<8x32xf32> to vector<8x8xf32>
    %93 = vector.extract_strided_slice %45 {offsets = [0, 16], sizes = [8, 8], strides = [1, 1]} : vector<8x32xf32> to vector<8x8xf32>
    %94 = tpu.transpose %92, [1, 0] : vector<8x8xf32> -> vector<8x8xf32>
    %cst_39 = arith.constant dense<0.000000e+00> : vector<8x8xf32>
    %95 = tpu.matmul %91, %94, %cst_39 {dimension_numbers = #tpu.dot_dimension_numbers<[1], [0], [0], [1], [0, 0, 1, 1], [], []>} : vector<8x8xf32>, vector<8x8xf32>, vector<8x8xf32> -> vector<8x8xf32>
    %cst_40 = arith.constant 0.353553385 : f32
    %96 = vector.broadcast %cst_40 : f32 to vector<8x8xf32>
    %97 = arith.mulf %95, %96 : vector<8x8xf32>
    %98 = arith.addf %97, %27 : vector<8x8xf32>
    %cst_41 = arith.constant dense<0xFF800000> : vector<8xf32>
    %99 = vector.multi_reduction <maximumf>, %98, %cst_41 [1] : vector<8x8xf32> to vector<8xf32>
    %100 = vector.shape_cast %99 : vector<8xf32> to vector<8x1xf32>
    %101 = vector.broadcast %100 : vector<8x1xf32> to vector<8x8xf32>
    %102 = arith.subf %98, %101 : vector<8x8xf32>
    %103 = math.exp %102 : vector<8x8xf32>
    %cst_42 = arith.constant dense<0.000000e+00> : vector<8xf32>
    %104 = vector.multi_reduction <add>, %103, %cst_42 [1] : vector<8x8xf32> to vector<8xf32>
    %105 = vector.shape_cast %104 : vector<8xf32> to vector<8x1xf32>
    %106 = tpu.reciprocal %105 {approx = true} : vector<8x1xf32> -> vector<8x1xf32>
    %107 = vector.broadcast %106 : vector<8x1xf32> to vector<8x8xf32>
    %108 = arith.mulf %103, %107 : vector<8x8xf32>
    %cst_43 = arith.constant dense<0.000000e+00> : vector<8x8xf32>
    %109 = tpu.matmul %108, %93, %cst_43 {dimension_numbers = #tpu.dot_dimension_numbers<[1], [0], [0], [1], [0, 0, 1, 1], [], []>} : vector<8x8xf32>, vector<8x8xf32>, vector<8x8xf32> -> vector<8x8xf32>
    %110 = vector.extract_strided_slice %29 {offsets = [16, 0], sizes = [8, 32], strides = [1, 1]} : vector<32x32xf32> to vector<8x32xf32>
    %cst_44 = arith.constant dense<0.000000e+00> : vector<8x32xf32>
    %111 = tpu.matmul %109, %110, %cst_44 {dimension_numbers = #tpu.dot_dimension_numbers<[1], [0], [0], [1], [0, 0, 1, 1], [], []>} : vector<8x8xf32>, vector<8x32xf32>, vector<8x32xf32> -> vector<8x32xf32>
    %112 = arith.addf %90, %111 : vector<8x32xf32>
    %113 = vector.extract_strided_slice %43 {offsets = [0, 24], sizes = [8, 8], strides = [1, 1]} : vector<8x32xf32> to vector<8x8xf32>
    %114 = vector.extract_strided_slice %44 {offsets = [0, 24], sizes = [8, 8], strides = [1, 1]} : vector<8x32xf32> to vector<8x8xf32>
    %115 = vector.extract_strided_slice %45 {offsets = [0, 24], sizes = [8, 8], strides = [1, 1]} : vector<8x32xf32> to vector<8x8xf32>
    %116 = tpu.transpose %114, [1, 0] : vector<8x8xf32> -> vector<8x8xf32>
    %cst_45 = arith.constant dense<0.000000e+00> : vector<8x8xf32>
    %117 = tpu.matmul %113, %116, %cst_45 {dimension_numbers = #tpu.dot_dimension_numbers<[1], [0], [0], [1], [0, 0, 1, 1], [], []>} : vector<8x8xf32>, vector<8x8xf32>, vector<8x8xf32> -> vector<8x8xf32>
    %cst_46 = arith.constant 0.353553385 : f32
    %118 = vector.broadcast %cst_46 : f32 to vector<8x8xf32>
    %119 = arith.mulf %117, %118 : vector<8x8xf32>
    %120 = arith.addf %119, %27 : vector<8x8xf32>
    %cst_47 = arith.constant dense<0xFF800000> : vector<8xf32>
    %121 = vector.multi_reduction <maximumf>, %120, %cst_47 [1] : vector<8x8xf32> to vector<8xf32>
    %122 = vector.shape_cast %121 : vector<8xf32> to vector<8x1xf32>
    %123 = vector.broadcast %122 : vector<8x1xf32> to vector<8x8xf32>
    %124 = arith.subf %120, %123 : vector<8x8xf32>
    %125 = math.exp %124 : vector<8x8xf32>
    %cst_48 = arith.constant dense<0.000000e+00> : vector<8xf32>
    %126 = vector.multi_reduction <add>, %125, %cst_48 [1] : vector<8x8xf32> to vector<8xf32>
    %127 = vector.shape_cast %126 : vector<8xf32> to vector<8x1xf32>
    %128 = tpu.reciprocal %127 {approx = true} : vector<8x1xf32> -> vector<8x1xf32>
    %129 = vector.broadcast %128 : vector<8x1xf32> to vector<8x8xf32>
    %130 = arith.mulf %125, %129 : vector<8x8xf32>
    %cst_49 = arith.constant dense<0.000000e+00> : vector<8x8xf32>
    %131 = tpu.matmul %130, %115, %cst_49 {dimension_numbers = #tpu.dot_dimension_numbers<[1], [0], [0], [1], [0, 0, 1, 1], [], []>} : vector<8x8xf32>, vector<8x8xf32>, vector<8x8xf32> -> vector<8x8xf32>
    %132 = vector.extract_strided_slice %29 {offsets = [24, 0], sizes = [8, 32], strides = [1, 1]} : vector<32x32xf32> to vector<8x32xf32>
    %cst_50 = arith.constant dense<0.000000e+00> : vector<8x32xf32>
    %133 = tpu.matmul %131, %132, %cst_50 {dimension_numbers = #tpu.dot_dimension_numbers<[1], [0], [0], [1], [0, 0, 1, 1], [], []>} : vector<8x8xf32>, vector<8x32xf32>, vector<8x32xf32> -> vector<8x32xf32>
    %134 = arith.addf %112, %133 : vector<8x32xf32>
    %135 = arith.addf %25, %134 : vector<8x32xf32>
    %136 = vector.broadcast %33 : vector<1x32xf32> to vector<8x32xf32>
    %137 = arith.addf %135, %136 : vector<8x32xf32>
    %cst_51 = arith.constant dense<0.000000e+00> : vector<8xf32>
    %138 = vector.multi_reduction <add>, %137, %cst_51 [1] : vector<8x32xf32> to vector<8xf32>
    %139 = vector.shape_cast %138 : vector<8xf32> to vector<8x1xf32>
    %cst_52 = arith.constant 3.200000e+01 : f32
    %140 = vector.broadcast %cst_52 : f32 to vector<8x1xf32>
    %141 = arith.divf %139, %140 : vector<8x1xf32>
    %142 = vector.broadcast %141 : vector<8x1xf32> to vector<8x32xf32>
    %143 = arith.subf %137, %142 : vector<8x32xf32>
    %144 = arith.mulf %143, %143 : vector<8x32xf32>
    %cst_53 = arith.constant dense<0.000000e+00> : vector<8xf32>
    %145 = vector.multi_reduction <add>, %144, %cst_53 [1] : vector<8x32xf32> to vector<8xf32>
    %146 = vector.shape_cast %145 : vector<8xf32> to vector<8x1xf32>
    %cst_54 = arith.constant 3.200000e+01 : f32
    %147 = vector.broadcast %cst_54 : f32 to vector<8x1xf32>
    %148 = arith.divf %146, %147 : vector<8x1xf32>
    %cst_55 = arith.constant 9.99999996E-13 : f32
    %149 = vector.broadcast %cst_55 : f32 to vector<8x1xf32>
    %150 = arith.addf %148, %149 : vector<8x1xf32>
    %151 = math.rsqrt %150 : vector<8x1xf32>
    %152 = vector.broadcast %141 : vector<8x1xf32> to vector<8x32xf32>
    %153 = arith.subf %137, %152 : vector<8x32xf32>
    %154 = vector.broadcast %151 : vector<8x1xf32> to vector<8x32xf32>
    %155 = arith.mulf %153, %154 : vector<8x32xf32>
    %156 = vector.broadcast %34 : vector<1x32xf32> to vector<8x32xf32>
    %157 = arith.mulf %155, %156 : vector<8x32xf32>
    %158 = vector.broadcast %35 : vector<1x32xf32> to vector<8x32xf32>
    %159 = arith.addf %157, %158 : vector<8x32xf32>
    %cst_56 = arith.constant dense<0.000000e+00> : vector<8x64xf32>
    %160 = tpu.matmul %159, %30, %cst_56 {dimension_numbers = #tpu.dot_dimension_numbers<[1], [0], [0], [1], [0, 0, 1, 1], [], []>} : vector<8x32xf32>, vector<32x64xf32>, vector<8x64xf32> -> vector<8x64xf32>
    %161 = vector.broadcast %36 : vector<1x64xf32> to vector<8x64xf32>
    %162 = arith.addf %160, %161 : vector<8x64xf32>
    %cst_57 = arith.constant 5.000000e-01 : f32
    %163 = vector.broadcast %cst_57 : f32 to vector<8x64xf32>
    %164 = arith.mulf %163, %162 : vector<8x64xf32>
    %cst_58 = arith.constant 4.471500e-02 : f32
    %165 = vector.broadcast %cst_58 : f32 to vector<8x64xf32>
    %166 = arith.mulf %165, %162 : vector<8x64xf32>
    %167 = arith.mulf %166, %162 : vector<8x64xf32>
    %168 = arith.mulf %167, %162 : vector<8x64xf32>
    %169 = arith.addf %162, %168 : vector<8x64xf32>
    %cst_59 = arith.constant 0.797884583 : f32
    %170 = vector.broadcast %cst_59 : f32 to vector<8x64xf32>
    %171 = arith.mulf %170, %169 : vector<8x64xf32>
    %172 = math.tanh %171 : vector<8x64xf32>
    %cst_60 = arith.constant 1.000000e+00 : f32
    %173 = vector.broadcast %cst_60 : f32 to vector<8x64xf32>
    %174 = arith.addf %173, %172 : vector<8x64xf32>
    %175 = arith.mulf %164, %174 : vector<8x64xf32>
    %cst_61 = arith.constant dense<0.000000e+00> : vector<8x32xf32>
    %176 = tpu.matmul %175, %31, %cst_61 {dimension_numbers = #tpu.dot_dimension_numbers<[1], [0], [0], [1], [0, 0, 1, 1], [], []>} : vector<8x64xf32>, vector<64x32xf32>, vector<8x32xf32> -> vector<8x32xf32>
    %177 = vector.broadcast %37 : vector<1x32xf32> to vector<8x32xf32>
    %178 = arith.addf %176, %177 : vector<8x32xf32>
    %179 = arith.addf %159, %178 : vector<8x32xf32>
    %cst_62 = arith.constant dense<0.000000e+00> : vector<8xf32>
    %180 = vector.multi_reduction <add>, %179, %cst_62 [1] : vector<8x32xf32> to vector<8xf32>
    %181 = vector.shape_cast %180 : vector<8xf32> to vector<8x1xf32>
    %cst_63 = arith.constant 3.200000e+01 : f32
    %182 = vector.broadcast %cst_63 : f32 to vector<8x1xf32>
    %183 = arith.divf %181, %182 : vector<8x1xf32>
    %184 = vector.broadcast %183 : vector<8x1xf32> to vector<8x32xf32>
    %185 = arith.subf %179, %184 : vector<8x32xf32>
    %186 = arith.mulf %185, %185 : vector<8x32xf32>
    %cst_64 = arith.constant dense<0.000000e+00> : vector<8xf32>
    %187 = vector.multi_reduction <add>, %186, %cst_64 [1] : vector<8x32xf32> to vector<8xf32>
    %188 = vector.shape_cast %187 : vector<8xf32> to vector<8x1xf32>
    %cst_65 = arith.constant 3.200000e+01 : f32
    %189 = vector.broadcast %cst_65 : f32 to vector<8x1xf32>
    %190 = arith.divf %188, %189 : vector<8x1xf32>
    %cst_66 = arith.constant 9.99999996E-13 : f32
    %191 = vector.broadcast %cst_66 : f32 to vector<8x1xf32>
    %192 = arith.addf %190, %191 : vector<8x1xf32>
    %193 = math.rsqrt %192 : vector<8x1xf32>
    %194 = vector.broadcast %183 : vector<8x1xf32> to vector<8x32xf32>
    %195 = arith.subf %179, %194 : vector<8x32xf32>
    %196 = vector.broadcast %193 : vector<8x1xf32> to vector<8x32xf32>
    %197 = arith.mulf %195, %196 : vector<8x32xf32>
    %198 = vector.broadcast %38 : vector<1x32xf32> to vector<8x32xf32>
    %199 = arith.mulf %197, %198 : vector<8x32xf32>
    %200 = vector.broadcast %39 : vector<1x32xf32> to vector<8x32xf32>
    %201 = arith.addf %199, %200 : vector<8x32xf32>
    %c160 = arith.constant 160 : index
    %c0_67 = arith.constant 0 : index
    %202 = vector.load %arg2[%c160, %c0_67] : memref<320x96xf32, #tpu.memory_space<vmem>>, vector<32x96xf32>
    %c192 = arith.constant 192 : index
    %c0_68 = arith.constant 0 : index
    %203 = vector.load %arg2[%c192, %c0_68] : memref<320x96xf32, #tpu.memory_space<vmem>>, vector<32x32xf32>
    %c224 = arith.constant 224 : index
    %c0_69 = arith.constant 0 : index
    %204 = vector.load %arg2[%c224, %c0_69] : memref<320x96xf32, #tpu.memory_space<vmem>>, vector<32x64xf32>
    %c256 = arith.constant 256 : index
    %c0_70 = arith.constant 0 : index
    %205 = vector.load %arg2[%c256, %c0_70] : memref<320x96xf32, #tpu.memory_space<vmem>>, vector<64x32xf32>
    %c10 = arith.constant 10 : index
    %c0_71 = arith.constant 0 : index
    %206 = vector.load %arg3[%c10, %c0_71] : memref<56x128xf32, #tpu.memory_space<vmem>>, vector<1x96xf32>
    %c11 = arith.constant 11 : index
    %c0_72 = arith.constant 0 : index
    %207 = vector.load %arg3[%c11, %c0_72] : memref<56x128xf32, #tpu.memory_space<vmem>>, vector<1x32xf32>
    %c12 = arith.constant 12 : index
    %c0_73 = arith.constant 0 : index
    %208 = vector.load %arg3[%c12, %c0_73] : memref<56x128xf32, #tpu.memory_space<vmem>>, vector<1x32xf32>
    %c13 = arith.constant 13 : index
    %c0_74 = arith.constant 0 : index
    %209 = vector.load %arg3[%c13, %c0_74] : memref<56x128xf32, #tpu.memory_space<vmem>>, vector<1x32xf32>
    %c14 = arith.constant 14 : index
    %c0_75 = arith.constant 0 : index
    %210 = vector.load %arg3[%c14, %c0_75] : memref<56x128xf32, #tpu.memory_space<vmem>>, vector<1x64xf32>
    %c15 = arith.constant 15 : index
    %c0_76 = arith.constant 0 : index
    %211 = vector.load %arg3[%c15, %c0_76] : memref<56x128xf32, #tpu.memory_space<vmem>>, vector<1x32xf32>
    %c16 = arith.constant 16 : index
    %c0_77 = arith.constant 0 : index
    %212 = vector.load %arg3[%c16, %c0_77] : memref<56x128xf32, #tpu.memory_space<vmem>>, vector<1x32xf32>
    %c17 = arith.constant 17 : index
    %c0_78 = arith.constant 0 : index
    %213 = vector.load %arg3[%c17, %c0_78] : memref<56x128xf32, #tpu.memory_space<vmem>>, vector<1x32xf32>
    %cst_79 = arith.constant dense<0.000000e+00> : vector<8x96xf32>
    %214 = tpu.matmul %201, %202, %cst_79 {dimension_numbers = #tpu.dot_dimension_numbers<[1], [0], [0], [1], [0, 0, 1, 1], [], []>} : vector<8x32xf32>, vector<32x96xf32>, vector<8x96xf32> -> vector<8x96xf32>
    %215 = vector.broadcast %206 : vector<1x96xf32> to vector<8x96xf32>
    %216 = arith.addf %214, %215 : vector<8x96xf32>
    %217 = vector.extract_strided_slice %216 {offsets = [0, 0], sizes = [8, 32], strides = [1, 1]} : vector<8x96xf32> to vector<8x32xf32>
    %218 = vector.extract_strided_slice %216 {offsets = [0, 32], sizes = [8, 32], strides = [1, 1]} : vector<8x96xf32> to vector<8x32xf32>
    %219 = vector.extract_strided_slice %216 {offsets = [0, 64], sizes = [8, 32], strides = [1, 1]} : vector<8x96xf32> to vector<8x32xf32>
    %cst_80 = arith.constant 0.000000e+00 : f32
    %220 = vector.broadcast %cst_80 : f32 to vector<8x32xf32>
    %221 = vector.extract_strided_slice %217 {offsets = [0, 0], sizes = [8, 8], strides = [1, 1]} : vector<8x32xf32> to vector<8x8xf32>
    %222 = vector.extract_strided_slice %218 {offsets = [0, 0], sizes = [8, 8], strides = [1, 1]} : vector<8x32xf32> to vector<8x8xf32>
    %223 = vector.extract_strided_slice %219 {offsets = [0, 0], sizes = [8, 8], strides = [1, 1]} : vector<8x32xf32> to vector<8x8xf32>
    %224 = tpu.transpose %222, [1, 0] : vector<8x8xf32> -> vector<8x8xf32>
    %cst_81 = arith.constant dense<0.000000e+00> : vector<8x8xf32>
    %225 = tpu.matmul %221, %224, %cst_81 {dimension_numbers = #tpu.dot_dimension_numbers<[1], [0], [0], [1], [0, 0, 1, 1], [], []>} : vector<8x8xf32>, vector<8x8xf32>, vector<8x8xf32> -> vector<8x8xf32>
    %cst_82 = arith.constant 0.353553385 : f32
    %226 = vector.broadcast %cst_82 : f32 to vector<8x8xf32>
    %227 = arith.mulf %225, %226 : vector<8x8xf32>
    %228 = arith.addf %227, %27 : vector<8x8xf32>
    %cst_83 = arith.constant dense<0xFF800000> : vector<8xf32>
    %229 = vector.multi_reduction <maximumf>, %228, %cst_83 [1] : vector<8x8xf32> to vector<8xf32>
    %230 = vector.shape_cast %229 : vector<8xf32> to vector<8x1xf32>
    %231 = vector.broadcast %230 : vector<8x1xf32> to vector<8x8xf32>
    %232 = arith.subf %228, %231 : vector<8x8xf32>
    %233 = math.exp %232 : vector<8x8xf32>
    %cst_84 = arith.constant dense<0.000000e+00> : vector<8xf32>
    %234 = vector.multi_reduction <add>, %233, %cst_84 [1] : vector<8x8xf32> to vector<8xf32>
    %235 = vector.shape_cast %234 : vector<8xf32> to vector<8x1xf32>
    %236 = tpu.reciprocal %235 {approx = true} : vector<8x1xf32> -> vector<8x1xf32>
    %237 = vector.broadcast %236 : vector<8x1xf32> to vector<8x8xf32>
    %238 = arith.mulf %233, %237 : vector<8x8xf32>
    %cst_85 = arith.constant dense<0.000000e+00> : vector<8x8xf32>
    %239 = tpu.matmul %238, %223, %cst_85 {dimension_numbers = #tpu.dot_dimension_numbers<[1], [0], [0], [1], [0, 0, 1, 1], [], []>} : vector<8x8xf32>, vector<8x8xf32>, vector<8x8xf32> -> vector<8x8xf32>
    %240 = vector.extract_strided_slice %203 {offsets = [0, 0], sizes = [8, 32], strides = [1, 1]} : vector<32x32xf32> to vector<8x32xf32>
    %cst_86 = arith.constant dense<0.000000e+00> : vector<8x32xf32>
    %241 = tpu.matmul %239, %240, %cst_86 {dimension_numbers = #tpu.dot_dimension_numbers<[1], [0], [0], [1], [0, 0, 1, 1], [], []>} : vector<8x8xf32>, vector<8x32xf32>, vector<8x32xf32> -> vector<8x32xf32>
    %242 = arith.addf %220, %241 : vector<8x32xf32>
    %243 = vector.extract_strided_slice %217 {offsets = [0, 8], sizes = [8, 8], strides = [1, 1]} : vector<8x32xf32> to vector<8x8xf32>
    %244 = vector.extract_strided_slice %218 {offsets = [0, 8], sizes = [8, 8], strides = [1, 1]} : vector<8x32xf32> to vector<8x8xf32>
    %245 = vector.extract_strided_slice %219 {offsets = [0, 8], sizes = [8, 8], strides = [1, 1]} : vector<8x32xf32> to vector<8x8xf32>
    %246 = tpu.transpose %244, [1, 0] : vector<8x8xf32> -> vector<8x8xf32>
    %cst_87 = arith.constant dense<0.000000e+00> : vector<8x8xf32>
    %247 = tpu.matmul %243, %246, %cst_87 {dimension_numbers = #tpu.dot_dimension_numbers<[1], [0], [0], [1], [0, 0, 1, 1], [], []>} : vector<8x8xf32>, vector<8x8xf32>, vector<8x8xf32> -> vector<8x8xf32>
    %cst_88 = arith.constant 0.353553385 : f32
    %248 = vector.broadcast %cst_88 : f32 to vector<8x8xf32>
    %249 = arith.mulf %247, %248 : vector<8x8xf32>
    %250 = arith.addf %249, %27 : vector<8x8xf32>
    %cst_89 = arith.constant dense<0xFF800000> : vector<8xf32>
    %251 = vector.multi_reduction <maximumf>, %250, %cst_89 [1] : vector<8x8xf32> to vector<8xf32>
    %252 = vector.shape_cast %251 : vector<8xf32> to vector<8x1xf32>
    %253 = vector.broadcast %252 : vector<8x1xf32> to vector<8x8xf32>
    %254 = arith.subf %250, %253 : vector<8x8xf32>
    %255 = math.exp %254 : vector<8x8xf32>
    %cst_90 = arith.constant dense<0.000000e+00> : vector<8xf32>
    %256 = vector.multi_reduction <add>, %255, %cst_90 [1] : vector<8x8xf32> to vector<8xf32>
    %257 = vector.shape_cast %256 : vector<8xf32> to vector<8x1xf32>
    %258 = tpu.reciprocal %257 {approx = true} : vector<8x1xf32> -> vector<8x1xf32>
    %259 = vector.broadcast %258 : vector<8x1xf32> to vector<8x8xf32>
    %260 = arith.mulf %255, %259 : vector<8x8xf32>
    %cst_91 = arith.constant dense<0.000000e+00> : vector<8x8xf32>
    %261 = tpu.matmul %260, %245, %cst_91 {dimension_numbers = #tpu.dot_dimension_numbers<[1], [0], [0], [1], [0, 0, 1, 1], [], []>} : vector<8x8xf32>, vector<8x8xf32>, vector<8x8xf32> -> vector<8x8xf32>
    %262 = vector.extract_strided_slice %203 {offsets = [8, 0], sizes = [8, 32], strides = [1, 1]} : vector<32x32xf32> to vector<8x32xf32>
    %cst_92 = arith.constant dense<0.000000e+00> : vector<8x32xf32>
    %263 = tpu.matmul %261, %262, %cst_92 {dimension_numbers = #tpu.dot_dimension_numbers<[1], [0], [0], [1], [0, 0, 1, 1], [], []>} : vector<8x8xf32>, vector<8x32xf32>, vector<8x32xf32> -> vector<8x32xf32>
    %264 = arith.addf %242, %263 : vector<8x32xf32>
    %265 = vector.extract_strided_slice %217 {offsets = [0, 16], sizes = [8, 8], strides = [1, 1]} : vector<8x32xf32> to vector<8x8xf32>
    %266 = vector.extract_strided_slice %218 {offsets = [0, 16], sizes = [8, 8], strides = [1, 1]} : vector<8x32xf32> to vector<8x8xf32>
    %267 = vector.extract_strided_slice %219 {offsets = [0, 16], sizes = [8, 8], strides = [1, 1]} : vector<8x32xf32> to vector<8x8xf32>
    %268 = tpu.transpose %266, [1, 0] : vector<8x8xf32> -> vector<8x8xf32>
    %cst_93 = arith.constant dense<0.000000e+00> : vector<8x8xf32>
    %269 = tpu.matmul %265, %268, %cst_93 {dimension_numbers = #tpu.dot_dimension_numbers<[1], [0], [0], [1], [0, 0, 1, 1], [], []>} : vector<8x8xf32>, vector<8x8xf32>, vector<8x8xf32> -> vector<8x8xf32>
    %cst_94 = arith.constant 0.353553385 : f32
    %270 = vector.broadcast %cst_94 : f32 to vector<8x8xf32>
    %271 = arith.mulf %269, %270 : vector<8x8xf32>
    %272 = arith.addf %271, %27 : vector<8x8xf32>
    %cst_95 = arith.constant dense<0xFF800000> : vector<8xf32>
    %273 = vector.multi_reduction <maximumf>, %272, %cst_95 [1] : vector<8x8xf32> to vector<8xf32>
    %274 = vector.shape_cast %273 : vector<8xf32> to vector<8x1xf32>
    %275 = vector.broadcast %274 : vector<8x1xf32> to vector<8x8xf32>
    %276 = arith.subf %272, %275 : vector<8x8xf32>
    %277 = math.exp %276 : vector<8x8xf32>
    %cst_96 = arith.constant dense<0.000000e+00> : vector<8xf32>
    %278 = vector.multi_reduction <add>, %277, %cst_96 [1] : vector<8x8xf32> to vector<8xf32>
    %279 = vector.shape_cast %278 : vector<8xf32> to vector<8x1xf32>
    %280 = tpu.reciprocal %279 {approx = true} : vector<8x1xf32> -> vector<8x1xf32>
    %281 = vector.broadcast %280 : vector<8x1xf32> to vector<8x8xf32>
    %282 = arith.mulf %277, %281 : vector<8x8xf32>
    %cst_97 = arith.constant dense<0.000000e+00> : vector<8x8xf32>
    %283 = tpu.matmul %282, %267, %cst_97 {dimension_numbers = #tpu.dot_dimension_numbers<[1], [0], [0], [1], [0, 0, 1, 1], [], []>} : vector<8x8xf32>, vector<8x8xf32>, vector<8x8xf32> -> vector<8x8xf32>
    %284 = vector.extract_strided_slice %203 {offsets = [16, 0], sizes = [8, 32], strides = [1, 1]} : vector<32x32xf32> to vector<8x32xf32>
    %cst_98 = arith.constant dense<0.000000e+00> : vector<8x32xf32>
    %285 = tpu.matmul %283, %284, %cst_98 {dimension_numbers = #tpu.dot_dimension_numbers<[1], [0], [0], [1], [0, 0, 1, 1], [], []>} : vector<8x8xf32>, vector<8x32xf32>, vector<8x32xf32> -> vector<8x32xf32>
    %286 = arith.addf %264, %285 : vector<8x32xf32>
    %287 = vector.extract_strided_slice %217 {offsets = [0, 24], sizes = [8, 8], strides = [1, 1]} : vector<8x32xf32> to vector<8x8xf32>
    %288 = vector.extract_strided_slice %218 {offsets = [0, 24], sizes = [8, 8], strides = [1, 1]} : vector<8x32xf32> to vector<8x8xf32>
    %289 = vector.extract_strided_slice %219 {offsets = [0, 24], sizes = [8, 8], strides = [1, 1]} : vector<8x32xf32> to vector<8x8xf32>
    %290 = tpu.transpose %288, [1, 0] : vector<8x8xf32> -> vector<8x8xf32>
    %cst_99 = arith.constant dense<0.000000e+00> : vector<8x8xf32>
    %291 = tpu.matmul %287, %290, %cst_99 {dimension_numbers = #tpu.dot_dimension_numbers<[1], [0], [0], [1], [0, 0, 1, 1], [], []>} : vector<8x8xf32>, vector<8x8xf32>, vector<8x8xf32> -> vector<8x8xf32>
    %cst_100 = arith.constant 0.353553385 : f32
    %292 = vector.broadcast %cst_100 : f32 to vector<8x8xf32>
    %293 = arith.mulf %291, %292 : vector<8x8xf32>
    %294 = arith.addf %293, %27 : vector<8x8xf32>
    %cst_101 = arith.constant dense<0xFF800000> : vector<8xf32>
    %295 = vector.multi_reduction <maximumf>, %294, %cst_101 [1] : vector<8x8xf32> to vector<8xf32>
    %296 = vector.shape_cast %295 : vector<8xf32> to vector<8x1xf32>
    %297 = vector.broadcast %296 : vector<8x1xf32> to vector<8x8xf32>
    %298 = arith.subf %294, %297 : vector<8x8xf32>
    %299 = math.exp %298 : vector<8x8xf32>
    %cst_102 = arith.constant dense<0.000000e+00> : vector<8xf32>
    %300 = vector.multi_reduction <add>, %299, %cst_102 [1] : vector<8x8xf32> to vector<8xf32>
    %301 = vector.shape_cast %300 : vector<8xf32> to vector<8x1xf32>
    %302 = tpu.reciprocal %301 {approx = true} : vector<8x1xf32> -> vector<8x1xf32>
    %303 = vector.broadcast %302 : vector<8x1xf32> to vector<8x8xf32>
    %304 = arith.mulf %299, %303 : vector<8x8xf32>
    %cst_103 = arith.constant dense<0.000000e+00> : vector<8x8xf32>
    %305 = tpu.matmul %304, %289, %cst_103 {dimension_numbers = #tpu.dot_dimension_numbers<[1], [0], [0], [1], [0, 0, 1, 1], [], []>} : vector<8x8xf32>, vector<8x8xf32>, vector<8x8xf32> -> vector<8x8xf32>
    %306 = vector.extract_strided_slice %203 {offsets = [24, 0], sizes = [8, 32], strides = [1, 1]} : vector<32x32xf32> to vector<8x32xf32>
    %cst_104 = arith.constant dense<0.000000e+00> : vector<8x32xf32>
    %307 = tpu.matmul %305, %306, %cst_104 {dimension_numbers = #tpu.dot_dimension_numbers<[1], [0], [0], [1], [0, 0, 1, 1], [], []>} : vector<8x8xf32>, vector<8x32xf32>, vector<8x32xf32> -> vector<8x32xf32>
    %308 = arith.addf %286, %307 : vector<8x32xf32>
    %309 = arith.addf %201, %308 : vector<8x32xf32>
    %310 = vector.broadcast %207 : vector<1x32xf32> to vector<8x32xf32>
    %311 = arith.addf %309, %310 : vector<8x32xf32>
    %cst_105 = arith.constant dense<0.000000e+00> : vector<8xf32>
    %312 = vector.multi_reduction <add>, %311, %cst_105 [1] : vector<8x32xf32> to vector<8xf32>
    %313 = vector.shape_cast %312 : vector<8xf32> to vector<8x1xf32>
    %cst_106 = arith.constant 3.200000e+01 : f32
    %314 = vector.broadcast %cst_106 : f32 to vector<8x1xf32>
    %315 = arith.divf %313, %314 : vector<8x1xf32>
    %316 = vector.broadcast %315 : vector<8x1xf32> to vector<8x32xf32>
    %317 = arith.subf %311, %316 : vector<8x32xf32>
    %318 = arith.mulf %317, %317 : vector<8x32xf32>
    %cst_107 = arith.constant dense<0.000000e+00> : vector<8xf32>
    %319 = vector.multi_reduction <add>, %318, %cst_107 [1] : vector<8x32xf32> to vector<8xf32>
    %320 = vector.shape_cast %319 : vector<8xf32> to vector<8x1xf32>
    %cst_108 = arith.constant 3.200000e+01 : f32
    %321 = vector.broadcast %cst_108 : f32 to vector<8x1xf32>
    %322 = arith.divf %320, %321 : vector<8x1xf32>
    %cst_109 = arith.constant 9.99999996E-13 : f32
    %323 = vector.broadcast %cst_109 : f32 to vector<8x1xf32>
    %324 = arith.addf %322, %323 : vector<8x1xf32>
    %325 = math.rsqrt %324 : vector<8x1xf32>
    %326 = vector.broadcast %315 : vector<8x1xf32> to vector<8x32xf32>
    %327 = arith.subf %311, %326 : vector<8x32xf32>
    %328 = vector.broadcast %325 : vector<8x1xf32> to vector<8x32xf32>
    %329 = arith.mulf %327, %328 : vector<8x32xf32>
    %330 = vector.broadcast %208 : vector<1x32xf32> to vector<8x32xf32>
    %331 = arith.mulf %329, %330 : vector<8x32xf32>
    %332 = vector.broadcast %209 : vector<1x32xf32> to vector<8x32xf32>
    %333 = arith.addf %331, %332 : vector<8x32xf32>
    %cst_110 = arith.constant dense<0.000000e+00> : vector<8x64xf32>
    %334 = tpu.matmul %333, %204, %cst_110 {dimension_numbers = #tpu.dot_dimension_numbers<[1], [0], [0], [1], [0, 0, 1, 1], [], []>} : vector<8x32xf32>, vector<32x64xf32>, vector<8x64xf32> -> vector<8x64xf32>
    %335 = vector.broadcast %210 : vector<1x64xf32> to vector<8x64xf32>
    %336 = arith.addf %334, %335 : vector<8x64xf32>
    %cst_111 = arith.constant 5.000000e-01 : f32
    %337 = vector.broadcast %cst_111 : f32 to vector<8x64xf32>
    %338 = arith.mulf %337, %336 : vector<8x64xf32>
    %cst_112 = arith.constant 4.471500e-02 : f32
    %339 = vector.broadcast %cst_112 : f32 to vector<8x64xf32>
    %340 = arith.mulf %339, %336 : vector<8x64xf32>
    %341 = arith.mulf %340, %336 : vector<8x64xf32>
    %342 = arith.mulf %341, %336 : vector<8x64xf32>
    %343 = arith.addf %336, %342 : vector<8x64xf32>
    %cst_113 = arith.constant 0.797884583 : f32
    %344 = vector.broadcast %cst_113 : f32 to vector<8x64xf32>
    %345 = arith.mulf %344, %343 : vector<8x64xf32>
    %346 = math.tanh %345 : vector<8x64xf32>
    %cst_114 = arith.constant 1.000000e+00 : f32
    %347 = vector.broadcast %cst_114 : f32 to vector<8x64xf32>
    %348 = arith.addf %347, %346 : vector<8x64xf32>
    %349 = arith.mulf %338, %348 : vector<8x64xf32>
    %cst_115 = arith.constant dense<0.000000e+00> : vector<8x32xf32>
    %350 = tpu.matmul %349, %205, %cst_115 {dimension_numbers = #tpu.dot_dimension_numbers<[1], [0], [0], [1], [0, 0, 1, 1], [], []>} : vector<8x64xf32>, vector<64x32xf32>, vector<8x32xf32> -> vector<8x32xf32>
    %351 = vector.broadcast %211 : vector<1x32xf32> to vector<8x32xf32>
    %352 = arith.addf %350, %351 : vector<8x32xf32>
    %353 = arith.addf %333, %352 : vector<8x32xf32>
    %cst_116 = arith.constant dense<0.000000e+00> : vector<8xf32>
    %354 = vector.multi_reduction <add>, %353, %cst_116 [1] : vector<8x32xf32> to vector<8xf32>
    %355 = vector.shape_cast %354 : vector<8xf32> to vector<8x1xf32>
    %cst_117 = arith.constant 3.200000e+01 : f32
    %356 = vector.broadcast %cst_117 : f32 to vector<8x1xf32>
    %357 = arith.divf %355, %356 : vector<8x1xf32>
    %358 = vector.broadcast %357 : vector<8x1xf32> to vector<8x32xf32>
    %359 = arith.subf %353, %358 : vector<8x32xf32>
    %360 = arith.mulf %359, %359 : vector<8x32xf32>
    %cst_118 = arith.constant dense<0.000000e+00> : vector<8xf32>
    %361 = vector.multi_reduction <add>, %360, %cst_118 [1] : vector<8x32xf32> to vector<8xf32>
    %362 = vector.shape_cast %361 : vector<8xf32> to vector<8x1xf32>
    %cst_119 = arith.constant 3.200000e+01 : f32
    %363 = vector.broadcast %cst_119 : f32 to vector<8x1xf32>
    %364 = arith.divf %362, %363 : vector<8x1xf32>
    %cst_120 = arith.constant 9.99999996E-13 : f32
    %365 = vector.broadcast %cst_120 : f32 to vector<8x1xf32>
    %366 = arith.addf %364, %365 : vector<8x1xf32>
    %367 = math.rsqrt %366 : vector<8x1xf32>
    %368 = vector.broadcast %357 : vector<8x1xf32> to vector<8x32xf32>
    %369 = arith.subf %353, %368 : vector<8x32xf32>
    %370 = vector.broadcast %367 : vector<8x1xf32> to vector<8x32xf32>
    %371 = arith.mulf %369, %370 : vector<8x32xf32>
    %372 = vector.broadcast %212 : vector<1x32xf32> to vector<8x32xf32>
    %373 = arith.mulf %371, %372 : vector<8x32xf32>
    %374 = vector.broadcast %213 : vector<1x32xf32> to vector<8x32xf32>
    %375 = arith.addf %373, %374 : vector<8x32xf32>
    %c24 = arith.constant 24 : index
    %c0_121 = arith.constant 0 : index
    %376 = vector.load %arg3[%c24, %c0_121] : memref<56x128xf32, #tpu.memory_space<vmem>>, vector<32x128xf32>
    %c18 = arith.constant 18 : index
    %c0_122 = arith.constant 0 : index
    %377 = vector.load %arg3[%c18, %c0_122] : memref<56x128xf32, #tpu.memory_space<vmem>>, vector<1x128xf32>
    %cst_123 = arith.constant dense<0.000000e+00> : vector<8x128xf32>
    %378 = tpu.matmul %375, %376, %cst_123 {dimension_numbers = #tpu.dot_dimension_numbers<[1], [0], [0], [1], [0, 0, 1, 1], [], []>} : vector<8x32xf32>, vector<32x128xf32>, vector<8x128xf32> -> vector<8x128xf32>
    %379 = vector.broadcast %377 : vector<1x128xf32> to vector<8x128xf32>
    %380 = arith.addf %378, %379 : vector<8x128xf32>
    %c0_124 = arith.constant 0 : index
    %c0_125 = arith.constant 0 : index
    %c0_126 = arith.constant 0 : index
    %381 = vector.load %arg4[%c0_124, %c0_125, %c0_126] : memref<1x8x128xf32, #tpu.memory_space<vmem>>, vector<1x8x128xf32>
    %382 = vector.shape_cast %381 : vector<1x8x128xf32> to vector<8x128xf32>
    %383 = vector.shape_cast %380 : vector<8x128xf32> to vector<1x8x128xf32>
    tpu.vector_store %arg4[%c0_124, %c0_125, %c0_126], %383 {strides = array<i32>} : memref<1x8x128xf32, #tpu.memory_space<vmem>>, vector<1x8x128xf32>,
    return
  }
  func.func @transform_0(%arg0: i32) -> (i32, i32, i32) {
    %c0_i32 = arith.constant 0 : i32
    %c0_i32_0 = arith.constant 0 : i32
    %c0_i32_1 = arith.constant 0 : i32
    return %arg0, %c0_i32, %c0_i32_0 : i32, i32, i32
  }
  func.func @transform_1(%arg0: i32) -> (i32, i32) {
    %c0_i32 = arith.constant 0 : i32
    %c0_i32_0 = arith.constant 0 : i32
    %c0_i32_1 = arith.constant 0 : i32
    return %c0_i32, %c0_i32_0 : i32, i32
  }
  func.func @transform_2(%arg0: i32) -> (i32, i32) {
    %c0_i32 = arith.constant 0 : i32
    %c0_i32_0 = arith.constant 0 : i32
    %c0_i32_1 = arith.constant 0 : i32
    return %c0_i32, %c0_i32_0 : i32, i32
  }
  func.func @transform_3(%arg0: i32) -> (i32, i32, i32) {
    %c0_i32 = arith.constant 0 : i32
    %c0_i32_0 = arith.constant 0 : i32
    %c0_i32_1 = arith.constant 0 : i32
    return %arg0, %c0_i32, %c0_i32_0 : i32, i32, i32
  }
}

</mosaic_0001>

<bundles_post_ra>
// kernel: tpu_custom_call.1
= control target key start
LH: loop header
LB: loop body
LE: loop exit
PB: predicated region body
PF: predicated region fallthrough
CT: control target
= control target key end

     0   :  { %8 = vsyncpa [#allocation3], 0  ;;  %s2057_s0 = inlined_call_operand.vmem [shape: f32[2,16,32], index: 0, kind: input, shape index: {}]   ;;  %s2058_s1 = inlined_call_operand.vmem [shape: f32[320,96], index: 1, kind: input, shape index: {}]   ;;  %s2059_s2 = inlined_call_operand.vmem [shape: f32[56,128], index: 2, kind: input, shape index: {}]   ;;  %s2060_s3 = inlined_call_operand.hbm [shape: f32[2,8,128], index: 3, kind: output, shape index: {}]  }
   0x1   :  { %10 = vsyncpa [#allocation3 + $0x1], 0  ;;  %s1631_s12 = smov 0   ;;  %s1633_s13 = smov 0  }
   0x2   :  { %s1635_s14 = smov 0   ;;  %s1637_s15 = smov 0  }
   0x3 LB: > { %s1652_s16 = sadd.s32 4294967295, %s1597_s15   ;;  %s1366_s17 = sadd.s32 4294967294, %s1597_s15   ;;  %s1597_s15 = sphi %s1637_s15, %s2072_s15   ;;  %s1593_s14 = sphi %s1635_s14, %s2071_s14   ;;  %s1589_s13 = sphi %s1633_s13, %s2070_s13   ;;  %s1585_s12 = sphi %s1631_s12, %s2069_s12  }
   0x4   : > { %s1656_s18 = sadd.s32 1, %s1597_s15   ;;  %s91_s19 = sadd.s32 1, %s1593_s14 }
   0x5   : > { %s88_s20 = ssub.s32 %s1597_s15, %s1656_s18  ;;  %p101_p0 = scmp.ne.s32.totalorder %s1593_s14, %s1589_s13 }
   0x6   : > { %p89_p1 = scmp.eq.s32.totalorder %s88_s20, 0  ;;  %p102_p2 = scmp.eq.s32.totalorder %s1652_s16, 1 }
   0x7   : > { %p107_p3 = scmp.ne.s32.totalorder %s1589_s13, %s1585_s12  ;;  %p108_p4 = scmp.eq.s32.totalorder %s1366_s17, 1 }
   0x8   : > { %s1667_s21 = scalar_select %p89_p1, %s1593_s14, %s91_s19  }
   0x9   : > { %p1669_p5 = por %p102_p2, %p101_p0  ;;  %p1673_p6 = por %p108_p4, %p107_p3 }
   0xa   : > { %p1369_p7 = scmp.ge.s32.totalorder %s1597_s15, 1  ;;  %p140_p8 = scmp.lt.s32.totalorder %s1597_s15, 3 }
   0xc   : > { %p141_p9 = pnand %p1369_p7, %p140_p8 }
   0xd   : > { %p164_p10 = scmp.lt.s32.totalorder (!%p141_p9), %s1652_s16, 1  ;;  %s1601_s26 = smov (!%p141_p9), 96  }
   0xe   : > { %144 = sbr.rel (%p141_p9) target bundleno = 4905 (0x1329), region = 32  ;;  %s1602_s27 = smov (!%p141_p9), 72  }
   0xf   : > { %s1603_s29 = smov (!%p141_p9), 80   ;;  %s1604_s5 = smov (!%p141_p9), 64  }
  0x10   : > { %s1606_s6 = smov (!%p141_p9), 104   ;;  %s1607_s7 = smov (!%p141_p9), 112  }
  0x11   : > { %s2062_s8 = smov (!%p141_p9), 48   ;;  %s2063_s9 = smov (!%p141_p9), 56  }
  0x12   : > { %s2061_s10 = smov (!%p141_p9), 40  }
  0x13   : > { %s165_s24 = scalar_select %p164_p10, %s1652_s16, 1  ;;  %vm172_vm0 = vcmask 261120   ;;  %v1599_v2 = vmov 32.0   ;;  %v210_v14 = vld [vmem:[%s2058_s1 + $0x18] sm:$0xff]  ;;  %v209_v15 = vld [vmem:[%s2058_s1 + $0x10] sm:$0xff]  ;;  %v208_v16 = vld [vmem:[%s2058_s1 + $0x8] sm:$0xff] }
  0x14   : > { %1487 = vrcp.f32 %v1599_v2  ;;  %251 = vmatpush.msra.mxu0 %v210_v14  ;;  %v207_v17 = vld [vmem:[%s2058_s1] sm:$0xff]  ;;  %vm262_vm5 = vcmask 64512   ;;  %vm684_vm9 = vcmask 523264  }
  0x15   : > { %s1416_s25 = sshll.u32 %s165_s24, 4  ;;  %v1468_v27 = vld [vmem:[%s2059_s2] ss:$0 sm:$0xff]  ;;  %v1469_v30 = vld [vmem:[%s2059_s2 + $0x1] ss:$0 sm:$0xff] }
  0x16   : > { %s1684_s28 = scalar_lea.vmem %s2057_s0, %s1416_s25  ;;  %252 = vmatpush.msra.mxu0 %v209_v15  ;;  %v1470_v33 = vld [vmem:[%s2059_s2 + $0x2] ss:$0 sm:$0xff]  ;;  %s1600_s25 = smov 88  }
  0x17   : > { %v171_v0 = vld [vmem:[%s1684_s28] sm:$0xff]  ;;  %v1737_v41 = vld [vmem:[%s1684_s28 + $0x8] sm:$0xff]  ;;  %s1605_s28 = smov 120  }
  0x18   : > { %v173_v1 = vsel %vm172_vm0, %v171_v0, 0.0  ;;  %253 = vmatpush.msra.mxu0 %v208_v16  ;;  %v211_v36 = vld [vmem:[%s2058_s1 + $0x20] sm:$0xff] }
  0x19   : > { %174 = vadd.xlane.f32.xlu0 %v173_v1  ;;  %434 = vmatpush.msra.mxu3 %v211_v36 }
  0x1a   : > { %v1488_v3 = vpop.eup %1487  ;;  %254 = vmatpush.msra.mxu0 %v207_v17 }
  0x1b   : > { %v177_v4 = vmul.f32 32.0, %v1488_v3  ;;  %vm181_vm1 = vweird.f32 %v1488_v3 }
  0x1d   : > { %v178_v5 = vsub.f32 1.0, %v177_v4 }
  0x1f   : > { %v179_v6 = vmul.f32 %v1488_v3, %v178_v5 }
  0x21   : > { %v180_v7 = vadd.f32 %v1488_v3, %v179_v6 }
  0x23   : > { %v1688_v8 = vsel %vm181_vm1, %v1488_v3, %v180_v7 }
  0x8c   : > { %v175_v9 = vpop.xlane.xlu0 %174 }
  0x8d   : > { %v183_v10 = vmul.f32 %v1688_v8, %v175_v9 }
  0x8f   : > { %v184_v11 = vsub.f32 %v171_v0, %v183_v10 }
  0x91   : > { %v185_v12 = vmul.f32 %v184_v11, %v184_v11 }
  0x93   : > { %v186_v13 = vsel %vm172_vm0, %v185_v12, 0.0 }
  0x94   : > { %187 = vadd.xlane.f32.xlu0 %v186_v13 }
 0x107   : > { %v188_v18 = vpop.xlane.xlu0 %187 }
 0x108   : > { %v189_v19 = vmul.f32 %v188_v18, %v1688_v8 }
 0x10a   : > { %v190_v20 = vadd.f32 1e-12, %v189_v19 }
 0x10c   : > { %1489 = vrsqrt.f32 %v190_v20  ;;  %vm197_vm3 = vweird.f32 %v190_v20 }
 0x112   : > { %v1490_v21 = vpop.eup %1489 }
 0x113   : > { %v192_v22 = vmul.f32 %v1490_v21, %v190_v20  ;;  %vm198_vm2 = vweird.f32 %v1490_v21 }
 0x114   : > { %vm199_vm4 = vmor %vm197_vm3, %vm198_vm2 }
 0x115   : > { %v193_v23 = vmul.f32 %v1490_v21, %v192_v22 }
 0x117   : > { %v194_v24 = vmul.f32 0.5, %v193_v23 }
 0x119   : > { %v195_v25 = vsub.f32 1.5, %v194_v24 }
 0x11b   : > { %v196_v26 = vmul.f32 %v1490_v21, %v195_v25 }
 0x11d   : > { %v200_v28 = vsel %vm199_vm4, %v1490_v21, %v196_v26 }
 0x11e   : > { %v201_v29 = vmul.f32 %v200_v28, %v184_v11 }
 0x120   : > { %v203_v31 = vmul.f32 %v1468_v27, %v201_v29 }
 0x122   : > { %v1711_v32 = vadd.f32 %v1469_v30, %v203_v31 }
 0x124   : > { %1373 = vmatmul.msk.f32.vlgmr.msra.gmra.mxu0 %vm172_vm0, %v1711_v32 }
 0x1a1   : > { %v256_v34 = vpop.f32.mrf.mxu0 }
 0x1a2   : > { %v1718_v35 = vadd.f32 %v1470_v33, %v256_v34 }
 0x1a4   : > { %328 = vrot.lane.b32.xlu0 %v1718_v35, %s1600_s25  ;;  %260 = vrot.lane.b32.xlu1 %v1718_v35, %s1601_s26 }
 0x1ac   : > { %532 = vrot.lane.b32.xlu0 %v1718_v35, %s1602_s27 }
 0x1b4   : > { %441 = vrot.lane.b32.xlu0 %v1718_v35, %s1603_s29 }
 0x216   : > { %v329_v37 = vpop.permute.xlu0 %328  ;;  %v261_v38 = vpop.permute.xlu1 %260 }
 0x217   : > { %1374 = vmatpush.xpose.msk.msra.mxu1 %vm262_vm5, %v261_v38  ;;  %v213_v38 = vld [vmem:[%s2058_s1 + $0x30] sm:$0xff] }
 0x21a   : > { %1375 = vmatmul.msk.f32.vlgmr.msra.gmra.mxu1 %vm262_vm5, %v1718_v35 }
 0x21e   : > { %v533_v39 = vpop.permute.xlu0 %532 }
 0x21f   : > { %1386 = vmatpush.xpose.msk.msrb.mxu3 %vm262_vm5, %v533_v39 }
 0x226   : > { %v442_v40 = vpop.permute.xlu0 %441 }
 0x227   : > { %1382 = vmatpush.xpose.msk.msrb.mxu0 %vm262_vm5, %v442_v40 }
 0x297   : > { %v284_v42 = vpop.f32.mrf.mxu1 }
 0x298   : > { %v287_v43 = vmul.f32 0.35355338, %v284_v42  ;;  %v214_v42 = vld [vmem:[%s2058_s1 + $0x38] sm:$0xff] }
 0x29a   : > { %v288_v44 = vadd.f32 %v287_v43, %v1737_v41 }
 0x29c   : > { %v289_v45 = vsel %vm262_vm5, %v288_v44, -inf }
 0x29d   : > { %290 = vmax.xlane.f32.xlu1 %v289_v45 }
 0x310   : > { %v291_v46 = vpop.xlane.xlu1 %290 }
 0x311   : > { %v292_v47 = vsub.f32 %v288_v44, %v291_v46 }
 0x313   : > { %v293_v48 = vmul.f32 1.442695, %v292_v47 }
 0x315   : > { %1491 = vpow2.f32 %v293_v48 }
 0x31b   : > { %v1492_v49 = vpop.eup %1491 }
 0x31c   : > { %v295_v50 = vsel %vm262_vm5, %v1492_v49, 0.0 }
 0x31d   : > { %296 = vadd.xlane.f32.xlu2 %v295_v50  ;;  %v1471_v50 = vld [vmem:[%s2059_s2 + $0x3] ss:$0 sm:$0xff] }
 0x335   : > { %300 = vrot.lane.b32.xlu2 %v1718_v35, %s1604_s5 }
 0x33d   : > { %326 = vrot.lane.b32.xlu2 %v1718_v35, %s1605_s28 }
 0x345   : > { %530 = vrot.lane.b32.xlu2 %v1718_v35, %s1606_s6 }
 0x34d   : > { %439 = vrot.lane.b32.xlu2 %v1718_v35, %s1607_s7 }
 0x390   : > { %v297_v51 = vpop.xlane.xlu2 %296 }
 0x391   : > { %1493 = vrcp.f32 %v297_v51 }
 0x397   : > { %v1494_v52 = vpop.eup %1493 }
 0x398   : > { %v301_v53 = vpop.permute.xlu2 %300  ;;  %v299_v54 = vmul.f32 %v1494_v52, %v1492_v49 }
 0x399   : > { %321 = vmatpush.msra.mxu2 %v301_v53 }
 0x39a   : > { %1376 = vmatmul.msk.f32.vlgmr.msra.gmra.mxu2 %vm262_vm5, %v299_v54 }
 0x39b   : > { %1377 = vmatpush.xpose.msk.msrb.mxu2 %vm262_vm5, %v329_v37 }
 0x3a0   : > { %v327_v55 = vpop.permute.xlu2 %326 }
 0x3a2   : > { %1378 = vmatmul.msk.f32.vlgmr.msrb.gmra.mxu2 %vm262_vm5, %v327_v55 }
 0x3a8   : > { %v531_v56 = vpop.permute.xlu2 %530 }
 0x3b0   : > { %v440_v57 = vpop.permute.xlu2 %439 }
 0x3b1   : > { %1383 = vmatmul.msk.f32.vlgmr.msrb.gmra.mxu0 %vm262_vm5, %v440_v57 }
 0x41d   : > { %v323_v58 = vpop.f32.mrf.mxu2 }
 0x41e   : > { %1381 = vmatmul.msk.f32.vlgmr.msra.gmra.mxu3 %vm262_vm5, %v323_v58 }
 0x425   : > { %v351_v59 = vpop.f32.mrf.mxu2 }
 0x426   : > { %v354_v60 = vmul.f32 0.35355338, %v351_v59  ;;  %1387 = vmatmul.msk.f32.vlgmr.msrb.gmra.mxu3 %vm262_vm5, %v531_v56  ;;  %v218_v59 = vld [vmem:[%s2058_s1 + $0x58] sm:$0xff] }
 0x428   : > { %v355_v61 = vadd.f32 %v354_v60, %v1737_v41  ;;  %v216_v60 = vld [vmem:[%s2058_s1 + $0x48] sm:$0xff] }
 0x42a   : > { %v356_v62 = vsel %vm262_vm5, %v355_v61, -inf }
 0x42b   : > { %357 = vmax.xlane.f32.xlu1 %v356_v62 }
 0x42e   : > { %v464_v63 = vpop.f32.mrf.mxu0 }
 0x42f   : > { %v467_v0 = vmul.f32 0.35355338, %v464_v63 }
 0x431   : > { %v468_v1 = vadd.f32 %v467_v0, %v1737_v41 }
 0x433   : > { %v469_v2 = vsel %vm262_vm5, %v468_v1, -inf }
 0x434   : > { %470 = vmax.xlane.f32.xlu0 %v469_v2 }
 0x49e   : > { %v358_v3 = vpop.xlane.xlu1 %357 }
 0x49f   : > { %v359_v4 = vsub.f32 %v355_v61, %v358_v3  ;;  %v215_v61 = vld [vmem:[%s2058_s1 + $0x40] sm:$0xff] }
 0x4a1   : > { %v360_v5 = vmul.f32 1.442695, %v359_v4  ;;  %v1760_v6 = vpop.f32.mrf.mxu3 }
 0x4a3   : > { %1495 = vpow2.f32 %v360_v5 }
 0x4a7   : > { %v471_v7 = vpop.xlane.xlu0 %470 }
 0x4a8   : > { %v472_v9 = vsub.f32 %v468_v1, %v471_v7  ;;  %v1472_v7 = vld [vmem:[%s2059_s2 + $0x4] ss:$0 sm:$0xff] }
 0x4a9   : > { %v1496_v10 = vpop.eup %1495  ;;  %v555_v11 = vpop.f32.mrf.mxu3 }
 0x4aa   : > { %v473_v12 = vmul.f32 1.442695, %v472_v9  ;;  %v558_v13 = vmul.f32 0.35355338, %v555_v11  ;;  %v362_v14 = vsel %vm262_vm5, %v1496_v10, 0.0 }
 0x4ab   : > { %363 = vadd.xlane.f32.xlu1 %v362_v14  ;;  %v1473_v11 = vld [vmem:[%s2059_s2 + $0x5] ss:$0 sm:$0xff]  ;;  %v226_v14 = vld [vmem:[%s2058_s1 + $0x98] sm:$0xff] }
 0x4ac   : > { %1497 = vpow2.f32 %v473_v12  ;;  %v559_v15 = vadd.f32 %v558_v13, %v1737_v41  ;;  %696 = vmatpush.msra.mxu3 %v226_v14 }
 0x4ae   : > { %v560_v16 = vsel %vm262_vm5, %v559_v15, -inf }
 0x4af   : > { %561 = vmax.xlane.f32.xlu2 %v560_v16  ;;  %v224_v16 = vld [vmem:[%s2058_s1 + $0x88] sm:$0xff] }
 0x4b2   : > { %v1498_v17 = vpop.eup %1497 }
 0x4b3   : > { %v475_v18 = vsel %vm262_vm5, %v1498_v17, 0.0 }
 0x4b4   : > { %476 = vadd.xlane.f32.xlu1 %v475_v18  ;;  %v222_v18 = vld [vmem:[%s2058_s1 + $0x78] sm:$0xff] }
 0x4c7   : > { %480 = vrot.lane.b32.xlu2 %v1718_v35, %s2062_s8 }
 0x4cd   : > { %367 = vrot.lane.b32.xlu1 %v1718_v35, %s2063_s9 }
 0x4d5   : > { %571 = vrot.lane.b32.xlu1 %v1718_v35, %s2061_s10  ;;  %v212_v35 = vld [vmem:[%s2058_s1 + $0x28] sm:$0xff] }
 0x4d6   : > { %411 = vmatpush.msrb.mxu1 %v212_v35  ;;  %v1475_v35 = vld [vmem:[%s2059_s2 + $0x7] ss:$0 sm:$0xff] }
 0x4d8   : > { %524 = vmatpush.msra.mxu1 %v213_v38 }
 0x51e   : > { %v364_v23 = vpop.xlane.xlu1 %363 }
 0x522   : > { %v562_v19 = vpop.xlane.xlu2 %561 }
 0x523   : > { %v563_v20 = vsub.f32 %v559_v15, %v562_v19  ;;  %v225_v15 = vld [vmem:[%s2058_s1 + $0x90] sm:$0xff] }
 0x524   : > { %697 = vmatpush.msra.mxu3 %v225_v15  ;;  %v221_v19 = vld [vmem:[%s2058_s1 + $0x70] sm:$0xff] }
 0x525   : > { %v564_v21 = vmul.f32 1.442695, %v563_v20  ;;  %v220_v20 = vld [vmem:[%s2058_s1 + $0x68] sm:$0xff] }
 0x526   : > { %698 = vmatpush.msra.mxu3 %v224_v16 }
 0x527   : > { %1499 = vpow2.f32 %v564_v21  ;;  %v477_v25 = vpop.xlane.xlu1 %476  ;;  %v219_v21 = vld [vmem:[%s2058_s1 + $0x60] sm:$0xff] }
 0x528   : > { %1501 = vrcp.f32 %v364_v23 }
 0x529   : > { %1503 = vrcp.f32 %v477_v25 }
 0x52a   : > { %v481_v29 = vpop.permute.xlu2 %480 }
 0x52d   : > { %v1500_v22 = vpop.eup %1499 }
 0x52e   : > { %v566_v24 = vsel %vm262_vm5, %v1500_v22, 0.0  ;;  %v1502_v26 = vpop.eup %1501 }
 0x52f   : > { %567 = vadd.xlane.f32.xlu0 %v566_v24  ;;  %v366_v27 = vmul.f32 %v1502_v26, %v1496_v10  ;;  %v1504_v30 = vpop.eup %1503 }
 0x530   : > { %v479_v31 = vmul.f32 %v1504_v30, %v1498_v17  ;;  %v223_v17 = vld [vmem:[%s2058_s1 + $0x80] sm:$0xff] }
 0x531   : > { %699 = vmatpush.msra.mxu3 %v223_v17 }
 0x533   : > { %700 = vmatpush.msra.mxu3 %v222_v18 }
 0x535   : > { %701 = vmatpush.msra.mxu3 %v221_v19 }
 0x537   : > { %702 = vmatpush.msra.mxu3 %v220_v20 }
 0x539   : > { %703 = vmatpush.msra.mxu3 %v219_v21 }
 0x53f   : > { %v368_v28 = vpop.permute.xlu1 %367 }
 0x540   : > { %388 = vmatpush.msra.mxu2 %v368_v28 }
 0x541   : > { %1379 = vmatmul.msk.f32.vlgmr.msra.gmra.mxu2 %vm262_vm5, %v366_v27 }
 0x542   : > { %501 = vmatpush.msrb.mxu2 %v481_v29 }
 0x544   : > { %615 = vmatpush.msra.mxu2 %v214_v42 }
 0x547   : > { %v572_v33 = vpop.permute.xlu1 %571 }
 0x548   : > { %592 = vmatpush.msra.mxu0 %v572_v33 }
 0x549   : > { %1384 = vmatmul.msk.f32.vlgmr.msrb.gmra.mxu2 %vm262_vm5, %v479_v31 }
 0x5a2   : > { %v568_v34 = vpop.xlane.xlu0 %567 }
 0x5a3   : > { %1505 = vrcp.f32 %v568_v34 }
 0x5a9   : > { %v1506_v36 = vpop.eup %1505 }
 0x5aa   : > { %v570_v37 = vmul.f32 %v1506_v36, %v1500_v22  ;;  %v1474_v22 = vld [vmem:[%s2059_s2 + $0x6] ss:$0 sm:$0xff] }
 0x5ac   : > { %1388 = vmatmul.msk.f32.vlgmr.msra.gmra.mxu0 %vm262_vm5, %v570_v37 }
 0x5c4   : > { %v390_v39 = vpop.f32.mrf.mxu2 }
 0x5c5   : > { %1380 = vmatmul.msk.f32.vlgmr.msrb.gmra.mxu1 %vm262_vm5, %v390_v39 }
 0x5c6   : > { %666 = vmatpush.msrb.mxu1 %v218_v59  ;;  %v1476_v59 = vld [vmem:[%s2059_s2 + $0x8] ss:$0 sm:$0xff] }
 0x5cc   : > { %v503_v40 = vpop.f32.mrf.mxu2 }
 0x5cd   : > { %1385 = vmatmul.msk.f32.vlgmr.msra.gmra.mxu1 %vm262_vm5, %v503_v40 }
 0x629   : > { %v594_v43 = vpop.f32.mrf.mxu0 }
 0x62a   : > { %1389 = vmatmul.msk.f32.vlgmr.msra.gmra.mxu2 %vm262_vm5, %v594_v43 }
 0x642   : > { %v413_v44 = vpop.f32.mrf.mxu1 }
 0x643   : > { %v437_v46 = vadd.f32 %v1760_v6, %v413_v44 }
 0x64a   : > { %v526_v45 = vpop.f32.mrf.mxu1 }
 0x64b   : > { %v529_v47 = vadd.f32 %v526_v45, %v437_v46  ;;  %v738_v46 = vld [vmem:[%s2058_s1 + $0xb8] sm:$0xff] }
 0x64c   : > { %779 = vmatpush.msrb.mxu0 %v738_v46 }
 0x6ad   : > { %v617_v48 = vpop.f32.mrf.mxu2 }
 0x6ae   : > { %v620_v49 = vadd.f32 %v617_v48, %v529_v47  ;;  %v737_v47 = vld [vmem:[%s2058_s1 + $0xb0] sm:$0xff]  ;;  %v736_v48 = vld [vmem:[%s2058_s1 + $0xa8] sm:$0xff] }
 0x6af   : > { %780 = vmatpush.msrb.mxu0 %v737_v47 }
 0x6b0   : > { %v621_v51 = vadd.f32 %v620_v49, %v1711_v32  ;;  %v217_v32 = vld [vmem:[%s2058_s1 + $0x50] sm:$0xff]  ;;  %v735_v49 = vld [vmem:[%s2058_s1 + $0xa0] sm:$0xff] }
 0x6b1   : > { %667 = vmatpush.msrb.mxu1 %v217_v32  ;;  %781 = vmatpush.msrb.mxu0 %v736_v48 }
 0x6b2   : > { %v623_v52 = vadd.f32 %v1471_v50, %v621_v51 }
 0x6b3   : > { %668 = vmatpush.msrb.mxu1 %v216_v60  ;;  %782 = vmatpush.msrb.mxu0 %v735_v49 }
 0x6b4   : > { %v624_v53 = vsel %vm172_vm0, %v623_v52, 0.0 }
 0x6b5   : > { %625 = vadd.xlane.f32.xlu0 %v624_v53  ;;  %669 = vmatpush.msrb.mxu1 %v215_v61  ;;  %v1477_v61 = vld [vmem:[%s2059_s2 + $0x9] ss:$0 sm:$0xff] }
 0x728   : > { %v626_v54 = vpop.xlane.xlu0 %625 }
 0x729   : > { %v627_v55 = vmul.f32 %v626_v54, %v1688_v8 }
 0x72b   : > { %v628_v56 = vsub.f32 %v623_v52, %v627_v55 }
 0x72d   : > { %v629_v57 = vmul.f32 %v628_v56, %v628_v56 }
 0x72f   : > { %v630_v58 = vsel %vm172_vm0, %v629_v57, 0.0 }
 0x730   : > { %631 = vadd.xlane.f32.xlu1 %v630_v58 }
 0x7a3   : > { %v632_v62 = vpop.xlane.xlu1 %631 }
 0x7a4   : > { %v633_v63 = vmul.f32 %v632_v62, %v1688_v8 }
 0x7a6   : > { %v634_v0 = vadd.f32 1e-12, %v633_v63 }
 0x7a8   : > { %1507 = vrsqrt.f32 %v634_v0  ;;  %vm641_vm7 = vweird.f32 %v634_v0 }
 0x7ae   : > { %v1508_v1 = vpop.eup %1507 }
 0x7af   : > { %v636_v2 = vmul.f32 %v1508_v1, %v634_v0  ;;  %vm642_vm6 = vweird.f32 %v1508_v1  ;;  %v1478_v0 = vld [vmem:[%s2059_s2 + $0xa] ss:$0 sm:$0xff] }
 0x7b0   : > { %vm643_vm8 = vmor %vm641_vm7, %vm642_vm6 }
 0x7b1   : > { %v637_v3 = vmul.f32 %v1508_v1, %v636_v2 }
 0x7b3   : > { %v638_v4 = vmul.f32 0.5, %v637_v3 }
 0x7b5   : > { %v639_v5 = vsub.f32 1.5, %v638_v4 }
 0x7b7   : > { %v640_v6 = vmul.f32 %v1508_v1, %v639_v5 }
 0x7b9   : > { %v644_v9 = vsel %vm643_vm8, %v1508_v1, %v640_v6 }
 0x7ba   : > { %v645_v10 = vmul.f32 %v644_v9, %v628_v56 }
 0x7bc   : > { %v647_v12 = vmul.f32 %v1472_v7, %v645_v10  ;;  %v739_v10 = vld [vmem:[%s2058_s1 + $0xc0] sm:$0xff] }
 0x7bd   : > { %961 = vmatpush.msrb.mxu3 %v739_v10 }
 0x7be   : > { %v649_v13 = vadd.f32 %v1473_v11, %v647_v12 }
 0x7c0   : > { %1390 = vmatmul.msk.f32.vlgmr.msrb.gmra.mxu1 %vm172_vm0, %v649_v13 }
 0x83d   : > { %v671_v23 = vpop.f32.mrf.mxu1 }
 0x83e   : > { %v672_v24 = vadd.f32 %v1474_v22, %v671_v23 }
 0x840   : > { %v675_v25 = vmul.f32 0.044715, %v672_v24  ;;  %v674_v31 = vmul.f32 0.5, %v672_v24 }
 0x842   : > { %v676_v26 = vmul.f32 %v675_v25, %v672_v24 }
 0x844   : > { %v677_v27 = vmul.f32 %v676_v26, %v672_v24 }
 0x846   : > { %v678_v28 = vadd.f32 %v677_v27, %v672_v24 }
 0x848   : > { %v679_v29 = vmul.f32 0.7978846, %v678_v28 }
 0x84a   : > { %1509 = vtanh.f32 %v679_v29 }
 0x850   : > { %v1510_v30 = vpop.eup %1509 }
 0x851   : > { %v681_v33 = vadd.f32 1.0, %v1510_v30 }
 0x853   : > { %v682_v34 = vmul.f32 %v681_v33, %v674_v31 }
 0x855   : > { %1391 = vmatmul.msk.f32.vlgmr.msra.gmra.mxu3 %vm684_vm9, %v682_v34 }
 0x8d8   : > { %v705_v36 = vpop.f32.mrf.mxu3 }
 0x8d9   : > { %v706_v37 = vadd.f32 %v1475_v35, %v705_v36 }
 0x8db   : > { %v708_v38 = vadd.f32 %v706_v37, %v649_v13 }
 0x8dd   : > { %v709_v39 = vsel %vm172_vm0, %v708_v38, 0.0 }
 0x8de   : > { %710 = vadd.xlane.f32.xlu0 %v709_v39 }
 0x951   : > { %v711_v40 = vpop.xlane.xlu0 %710 }
 0x952   : > { %v712_v42 = vmul.f32 %v711_v40, %v1688_v8 }
 0x954   : > { %v713_v43 = vsub.f32 %v708_v38, %v712_v42 }
 0x956   : > { %v714_v44 = vmul.f32 %v713_v43, %v713_v43 }
 0x958   : > { %v715_v45 = vsel %vm172_vm0, %v714_v44, 0.0 }
 0x959   : > { %716 = vadd.xlane.f32.xlu0 %v715_v45 }
 0x9cc   : > { %v717_v50 = vpop.xlane.xlu0 %716 }
 0x9cd   : > { %v718_v51 = vmul.f32 %v717_v50, %v1688_v8 }
 0x9cf   : > { %v719_v52 = vadd.f32 1e-12, %v718_v51 }
 0x9d1   : > { %1511 = vrsqrt.f32 %v719_v52  ;;  %vm726_vm11 = vweird.f32 %v719_v52 }
 0x9d7   : > { %v1512_v53 = vpop.eup %1511 }
 0x9d8   : > { %v721_v54 = vmul.f32 %v1512_v53, %v719_v52  ;;  %vm727_vm10 = vweird.f32 %v1512_v53 }
 0x9d9   : > { %vm728_vm12 = vmor %vm726_vm11, %vm727_vm10 }
 0x9da   : > { %v722_v55 = vmul.f32 %v1512_v53, %v721_v54 }
 0x9dc   : > { %v723_v56 = vmul.f32 0.5, %v722_v55 }
 0x9de   : > { %v724_v57 = vsub.f32 1.5, %v723_v56  ;;  %v740_v56 = vld [vmem:[%s2058_s1 + $0xc8] sm:$0xff] }
 0x9e0   : > { %v725_v58 = vmul.f32 %v1512_v53, %v724_v57 }
 0x9e2   : > { %v729_v32 = vsel %vm728_vm12, %v1512_v53, %v725_v58 }
 0x9e3   : > { %v730_v60 = vmul.f32 %v729_v32, %v713_v43 }
 0x9e5   : > { %v732_v62 = vmul.f32 %v1476_v59, %v730_v60 }
 0x9e7   : > { %v1869_v63 = vadd.f32 %v1477_v61, %v732_v62 }
 0x9e9   : > { %1392 = vmatmul.msk.f32.vlgmr.msrb.gmra.mxu0 %vm172_vm0, %v1869_v63 }
 0xa66   : > { %v784_v1 = vpop.f32.mrf.mxu0 }
 0xa67   : > { %v1876_v2 = vadd.f32 %v1478_v0, %v784_v1  ;;  %v741_v1 = vld [vmem:[%s2058_s1 + $0xd0] sm:$0xff] }
 0xa69   : > { %855 = vrot.lane.b32.xlu1 %v1876_v2, %s1600_s25  ;;  %788 = vrot.lane.b32.xlu2 %v1876_v2, %s1601_s26  ;;  %s1555_s25 = scalar_lea.hbm %s2060_s3, 16 }
 0xa71   : > { %966 = vrot.lane.b32.xlu1 %v1876_v2, %s1607_s7 }
 0xac3   : > { %v789_v3 = vpop.permute.xlu2 %788 }
 0xac4   : > { %1393 = vmatpush.xpose.msk.msrb.mxu2 %vm262_vm5, %v789_v3 }
 0xac7   : > { %1394 = vmatmul.msk.f32.vlgmr.msrb.gmra.mxu2 %vm262_vm5, %v1876_v2 }
 0xadb   : > { %v856_v4 = vpop.permute.xlu1 %855 }
 0xadc   : > { %1396 = vmatpush.xpose.msk.msra.mxu0 %vm262_vm5, %v856_v4 }
 0xae3   : > { %v967_v23 = vpop.permute.xlu1 %966 }
 0xb4a   : > { %v811_v5 = vpop.f32.mrf.mxu2 }
 0xb4b   : > { %v814_v6 = vmul.f32 0.35355338, %v811_v5 }
 0xb4d   : > { %v815_v7 = vadd.f32 %v814_v6, %v1737_v41 }
 0xb4f   : > { %v816_v9 = vsel %vm262_vm5, %v815_v7, -inf }
 0xb50   : > { %817 = vmax.xlane.f32.xlu0 %v816_v9 }
 0xb64   : > { %827 = vrot.lane.b32.xlu0 %v1876_v2, %s1604_s5 }
 0xb6c   : > { %853 = vrot.lane.b32.xlu0 %v1876_v2, %s1605_s28  ;;  %s1413_s28 = sshll.u32 %s1652_s16, 3 }
 0xb6d   : > { %s1302_s17 = scalar_lea.hbm %s2060_s3, %s1413_s28 }
 0xb6e   : > { %s1306_s20 = sshll.u32 %s1302_s17, 4  ;;  %s1307_s20 = int_to_ptr.hbm [resolvable:$true] %s1306_s20 }
 0xb6f   : > { %s1549_s30 = sshra.s32 %s1307_s20, 4  ;;  %s1550_s30 = int_to_ptr.hbm [resolvable:$true] %s1549_s30 }
 0xb70   : > { %s1551_s16 = scalar_lea.hbm %s1550_s30, 8  ;;  %p1556_p0 = scmp.lt.s32.totalorder %s1550_s30, %s2060_s3 }
 0xb71   : > { %p1552_p11 = scmp.ne.s32.totalorder %s1550_s30, %s1551_s16  ;;  %p1557_p1 = scmp.lt.s32.totalorder %s1555_s25, %s1551_s16 }
 0xb73   : > { %p1553_p12 = pnand %p1552_p11, %p1669_p5  ;;  %p1558_p2 = por %p1557_p1, %p1556_p0 }
 0xb74   : > { %1059 = vrot.lane.b32.xlu0 %v1876_v2, %s1602_s27  ;;  %s2066_s27 = smov 56  }
 0xb75   : > { %p1554_p13 = pneg %p1553_p12 }
 0xb77   : > { %p1559_p3 = pnand %p1558_p2, %p1554_p13 }
 0xb7c   : > { %1057 = vrot.lane.b32.xlu0 %v1876_v2, %s1606_s6  ;;  %s2068_s6 = smov 40  }
 0xbc3   : > { %v818_v11 = vpop.xlane.xlu0 %817 }
 0xbc4   : > { %v819_v12 = vsub.f32 %v815_v7, %v818_v11 }
 0xbc6   : > { %v820_v13 = vmul.f32 1.442695, %v819_v12 }
 0xbc8   : > { %1513 = vpow2.f32 %v820_v13 }
 0xbce   : > { %v1514_v14 = vpop.eup %1513 }
 0xbcf   : > { %v822_v15 = vsel %vm262_vm5, %v1514_v14, 0.0 }
 0xbd0   : > { %823 = vadd.xlane.f32.xlu2 %v822_v15 }
 0xbd6   : > { %v828_v16 = vpop.permute.xlu0 %827 }
 0xbd7   : > { %848 = vmatpush.msra.mxu1 %v828_v16  ;;  %v1479_v16 = vld [vmem:[%s2059_s2 + $0xb] ss:$0 sm:$0xff] }
 0xbd9   : > { %938 = vmatpush.msrb.mxu1 %v740_v56 }
 0xbde   : > { %v854_v17 = vpop.permute.xlu0 %853 }
 0xbdf   : > { %1397 = vmatmul.msk.f32.vlgmr.msra.gmra.mxu0 %vm262_vm5, %v854_v17 }
 0xbe6   : > { %v1060_v18 = vpop.permute.xlu0 %1059 }
 0xbe7   : > { %1405 = vmatpush.xpose.msk.msra.mxu3 %vm262_vm5, %v1060_v18 }
 0xbe8   : > { %968 = vrot.lane.b32.xlu2 %v1876_v2, %s1603_s29  ;;  %s2067_s29 = smov 48  }
 0xbee   : > { %v1058_v30 = vpop.permute.xlu0 %1057 }
 0xc43   : > { %v824_v19 = vpop.xlane.xlu2 %823 }
 0xc44   : > { %1515 = vrcp.f32 %v824_v19 }
 0xc4a   : > { %v1516_v20 = vpop.eup %1515 }
 0xc4b   : > { %v826_v21 = vmul.f32 %v1516_v20, %v1514_v14  ;;  %v969_v22 = vpop.permute.xlu2 %968 }
 0xc4c   : > { %1401 = vmatpush.xpose.msk.msrb.mxu0 %vm262_vm5, %v969_v22 }
 0xc4d   : > { %1395 = vmatmul.msk.f32.vlgmr.msra.gmra.mxu1 %vm262_vm5, %v826_v21 }
 0xc4e   : > { %1051 = vmatpush.msra.mxu1 %v741_v1 }
 0xc4f   : > { %1402 = vmatmul.msk.f32.vlgmr.msrb.gmra.mxu0 %vm262_vm5, %v967_v23 }
 0xc5c   : > { %v878_v24 = vpop.f32.mrf.mxu0 }
 0xc5d   : > { %v881_v25 = vmul.f32 0.35355338, %v878_v24 }
 0xc5f   : > { %v882_v26 = vadd.f32 %v881_v25, %v1737_v41  ;;  %v746_v25 = vld [vmem:[%s2058_s1 + $0xf8] sm:$0xff] }
 0xc61   : > { %v883_v27 = vsel %vm262_vm5, %v882_v26, -inf }
 0xc62   : > { %884 = vmax.xlane.f32.xlu0 %v883_v27  ;;  %v743_v27 = vld [vmem:[%s2058_s1 + $0xe0] sm:$0xff] }
 0xcca   : > { %v850_v28 = vpop.f32.mrf.mxu1 }
 0xccb   : > { %1400 = vmatmul.msk.f32.vlgmr.msrb.gmra.mxu3 %vm262_vm5, %v850_v28 }
 0xccc   : > { %v991_v29 = vpop.f32.mrf.mxu0 }
 0xccd   : > { %v994_v31 = vmul.f32 0.35355338, %v991_v29 }
 0xccf   : > { %v995_v33 = vadd.f32 %v994_v31, %v1737_v41 }
 0xcd1   : > { %v996_v34 = vsel %vm262_vm5, %v995_v33, -inf }
 0xcd2   : > { %997 = vmax.xlane.f32.xlu1 %v996_v34 }
 0xcd3   : > { %1406 = vmatmul.msk.f32.vlgmr.msra.gmra.mxu3 %vm262_vm5, %v1058_v30 }
 0xcd5   : > { %v885_v35 = vpop.xlane.xlu0 %884 }
 0xcd6   : > { %v886_v36 = vsub.f32 %v882_v26, %v885_v35  ;;  %v744_v26 = vld [vmem:[%s2058_s1 + $0xe8] sm:$0xff] }
 0xcd8   : > { %v887_v37 = vmul.f32 1.442695, %v886_v36 }
 0xcda   : > { %1517 = vpow2.f32 %v887_v37 }
 0xce0   : > { %v1518_v38 = vpop.eup %1517 }
 0xce1   : > { %v889_v39 = vsel %vm262_vm5, %v1518_v38, 0.0 }
 0xce2   : > { %890 = vadd.xlane.f32.xlu0 %v889_v39 }
 0xcf6   : > { %894 = vrot.lane.b32.xlu0 %v1876_v2, %s2066_s27 }
 0xd45   : > { %v998_v40 = vpop.xlane.xlu1 %997 }
 0xd46   : > { %v999_v42 = vsub.f32 %v995_v33, %v998_v40 }
 0xd48   : > { %v1000_v43 = vmul.f32 1.442695, %v999_v42  ;;  %v1481_v42 = vld [vmem:[%s2059_s2 + $0xd] ss:$0 sm:$0xff] }
 0xd4a   : > { %1519 = vpow2.f32 %v1000_v43 }
 0xd4e   : > { %v963_v44 = vpop.f32.mrf.mxu3 }
 0xd50   : > { %v1520_v45 = vpop.eup %1519 }
 0xd51   : > { %v1002_v46 = vsel %vm262_vm5, %v1520_v45, 0.0 }
 0xd52   : > { %1003 = vadd.xlane.f32.xlu1 %v1002_v46  ;;  %v753_v46 = vld [vmem:[%s2058_s1 + $0x130] sm:$0xff] }
 0xd55   : > { %v891_v51 = vpop.xlane.xlu0 %890 }
 0xd56   : > { %v1082_v47 = vpop.f32.mrf.mxu3  ;;  %1521 = vrcp.f32 %v891_v51  ;;  %v748_v51 = vld [vmem:[%s2058_s1 + $0x108] sm:$0xff] }
 0xd57   : > { %v1085_v48 = vmul.f32 0.35355338, %v1082_v47  ;;  %v752_v47 = vld [vmem:[%s2058_s1 + $0x128] sm:$0xff] }
 0xd59   : > { %v1086_v49 = vadd.f32 %v1085_v48, %v1737_v41  ;;  %v751_v48 = vld [vmem:[%s2058_s1 + $0x120] sm:$0xff] }
 0xd5b   : > { %v1087_v50 = vsel %vm262_vm5, %v1086_v49, -inf }
 0xd5c   : > { %1088 = vmax.xlane.f32.xlu2 %v1087_v50  ;;  %v1522_v52 = vpop.eup %1521  ;;  %v749_v50 = vld [vmem:[%s2058_s1 + $0x110] sm:$0xff] }
 0xd5d   : > { %v893_v53 = vmul.f32 %v1522_v52, %v1518_v38  ;;  %v1480_v38 = vld [vmem:[%s2059_s2 + $0xc] ss:$0 sm:$0xff]  ;;  %v747_v52 = vld [vmem:[%s2058_s1 + $0x100] sm:$0xff] }
 0xd68   : > { %v895_v54 = vpop.permute.xlu0 %894 }
 0xd69   : > { %915 = vmatpush.msra.mxu2 %v895_v54 }
 0xd6a   : > { %1398 = vmatmul.msk.f32.vlgmr.msra.gmra.mxu2 %vm262_vm5, %v893_v53  ;;  %v1482_v53 = vld [vmem:[%s2059_s2 + $0xe] ss:$0 sm:$0xff] }
 0xd74   : > { %1007 = vrot.lane.b32.xlu2 %v1876_v2, %s2067_s29  ;;  %s161_s29 = sand.u32 1, %s1589_s13  }
 0xd75   : > { %s1370_s5 = sshll.u32 %s161_s29, 3  ;;  %s1292_s24 = scalar_lea.sflag [#allocation3], %s161_s29 }
 0xd76   : > { %s163_s8 = scalar_lea.vmem [#allocation2], %s1370_s5 }
 0xd77   : > { %s1304_s9 = sshll.u32 %s163_s8, 4  ;;  %s1305_s9 = int_to_ptr.vmem [resolvable:$true] %s1304_s9 }
 0xdc5   : > { %v1004_v55 = vpop.xlane.xlu1 %1003 }
 0xdc6   : > { %1523 = vrcp.f32 %v1004_v55 }
 0xdcc   : > { %v1524_v59 = vpop.eup %1523 }
 0xdcd   : > { %v1006_v32 = vmul.f32 %v1524_v59, %v1520_v45  ;;  %v754_v45 = vld [vmem:[%s2058_s1 + $0x138] sm:$0xff] }
 0xdce   : > { %1222 = vmatpush.msrb.mxu3 %v754_v45 }
 0xdcf   : > { %v1089_v41 = vpop.xlane.xlu2 %1088 }
 0xdd0   : > { %v1090_v57 = vsub.f32 %v1086_v49, %v1089_v41  ;;  %1223 = vmatpush.msrb.mxu3 %v753_v46  ;;  %v750_v49 = vld [vmem:[%s2058_s1 + $0x118] sm:$0xff] }
 0xdd2   : > { %v1091_v58 = vmul.f32 1.442695, %v1090_v57  ;;  %1224 = vmatpush.msrb.mxu3 %v752_v47 }
 0xdd4   : > { %1525 = vpow2.f32 %v1091_v58  ;;  %1225 = vmatpush.msrb.mxu3 %v751_v48 }
 0xdd6   : > { %1226 = vmatpush.msrb.mxu3 %v750_v49 }
 0xdd7   : > { %v1008_v60 = vpop.permute.xlu2 %1007 }
 0xdd8   : > { %1028 = vmatpush.msrb.mxu2 %v1008_v60  ;;  %1227 = vmatpush.msrb.mxu3 %v749_v50 }
 0xdd9   : > { %1403 = vmatmul.msk.f32.vlgmr.msrb.gmra.mxu2 %vm262_vm5, %v1006_v32 }
 0xdda   : > { %v1526_v61 = vpop.eup %1525  ;;  %1228 = vmatpush.msrb.mxu3 %v748_v51 }
 0xddb   : > { %v1093_v62 = vsel %vm262_vm5, %v1526_v61, 0.0 }
 0xddc   : > { %1094 = vadd.xlane.f32.xlu1 %v1093_v62  ;;  %1229 = vmatpush.msrb.mxu3 %v747_v52 }
 0xded   : > { %v917_v0 = vpop.f32.mrf.mxu2 }
 0xdee   : > { %1399 = vmatmul.msk.f32.vlgmr.msrb.gmra.mxu1 %vm262_vm5, %v917_v0  ;;  %v1483_v0 = vld [vmem:[%s2059_s2 + $0xf] ss:$0 sm:$0xff] }
 0xdef   : > { %1193 = vmatpush.msrb.mxu1 %v746_v25 }
 0xdf5   : > { %1098 = vrot.lane.b32.xlu1 %v1876_v2, %s2068_s6  ;;  %v742_v2 = vld [vmem:[%s2058_s1 + $0xd8] sm:$0xff] }
 0xdf6   : > { %1142 = vmatpush.msra.mxu2 %v742_v2 }
 0xe4f   : > { %v1095_v3 = vpop.xlane.xlu1 %1094 }
 0xe50   : > { %1527 = vrcp.f32 %v1095_v3 }
 0xe56   : > { %v1528_v5 = vpop.eup %1527 }
 0xe57   : > { %v1097_v6 = vmul.f32 %v1528_v5, %v1526_v61 }
 0xe5c   : > { %v1030_v4 = vpop.f32.mrf.mxu2 }
 0xe5d   : > { %1404 = vmatmul.msk.f32.vlgmr.msra.gmra.mxu1 %vm262_vm5, %v1030_v4 }
 0xe67   : > { %v1099_v7 = vpop.permute.xlu1 %1098 }
 0xe68   : > { %1119 = vmatpush.msra.mxu0 %v1099_v7 }
 0xe69   : > { %1407 = vmatmul.msk.f32.vlgmr.msra.gmra.mxu0 %vm262_vm5, %v1097_v6 }
 0xe6b   : > { %v940_v10 = vpop.f32.mrf.mxu1 }
 0xe6c   : > { %v964_v12 = vadd.f32 %v963_v44, %v940_v10 }
 0xeda   : > { %v1053_v11 = vpop.f32.mrf.mxu1 }
 0xedb   : > { %v1056_v13 = vadd.f32 %v1053_v11, %v964_v12  ;;  %v1264_v11 = vld [vmem:[%s2059_s2 + $0x30] sm:$0xff]  ;;  %v1263_v12 = vld [vmem:[%s2059_s2 + $0x28] sm:$0xff] }
 0xedc   : > { %1282 = vmatpush.msrb.mxu0 %v1264_v11 }
 0xede   : > { %1283 = vmatpush.msrb.mxu0 %v1263_v12 }
 0xee6   : > { %v1121_v9 = vpop.f32.mrf.mxu0 }
 0xee7   : > { %1408 = vmatmul.msk.f32.vlgmr.msra.gmra.mxu2 %vm262_vm5, %v1121_v9 }
 0xf6a   : > { %v1144_v14 = vpop.f32.mrf.mxu2 }
 0xf6b   : > { %v1147_v15 = vadd.f32 %v1144_v14, %v1056_v13  ;;  %v1262_v13 = vld [vmem:[%s2059_s2 + $0x20] sm:$0xff]  ;;  %v1261_v14 = vld [vmem:[%s2059_s2 + $0x18] sm:$0xff] }
 0xf6c   : > { %1284 = vmatpush.msrb.mxu0 %v1262_v13 }
 0xf6d   : > { %v1148_v17 = vadd.f32 %v1147_v15, %v1869_v63  ;;  %v745_v63 = vld [vmem:[%s2058_s1 + $0xf0] sm:$0xff] }
 0xf6e   : > { %1194 = vmatpush.msrb.mxu1 %v745_v63  ;;  %1285 = vmatpush.msrb.mxu0 %v1261_v14 }
 0xf6f   : > { %v1150_v18 = vadd.f32 %v1479_v16, %v1148_v17 }
 0xf70   : > { %1195 = vmatpush.msrb.mxu1 %v744_v26 }
 0xf71   : > { %v1151_v19 = vsel %vm172_vm0, %v1150_v18, 0.0 }
 0xf72   : > { %1152 = vadd.xlane.f32.xlu0 %v1151_v19  ;;  %1196 = vmatpush.msrb.mxu1 %v743_v27 }
 0xfe5   : > { %v1153_v20 = vpop.xlane.xlu0 %1152 }
 0xfe6   : > { %v1154_v21 = vmul.f32 %v1153_v20, %v1688_v8 }
 0xfe8   : > { %v1155_v22 = vsub.f32 %v1150_v18, %v1154_v21 }
 0xfea   : > { %v1156_v23 = vmul.f32 %v1155_v22, %v1155_v22 }
 0xfec   : > { %v1157_v24 = vsel %vm172_vm0, %v1156_v23, 0.0 }
 0xfed   : > { %1158 = vadd.xlane.f32.xlu2 %v1157_v24  ;;  %v1484_v24 = vld [vmem:[%s2059_s2 + $0x10] ss:$0 sm:$0xff] }
0x1060   : > { %v1159_v28 = vpop.xlane.xlu2 %1158 }
0x1061   : > { %v1160_v29 = vmul.f32 %v1159_v28, %v1688_v8  ;;  %v1486_v28 = vld [vmem:[%s2059_s2 + $0x12] ss:$0 sm:$0xff] }
0x1063   : > { %v1161_v30 = vadd.f32 1e-12, %v1160_v29 }
0x1065   : > { %1529 = vrsqrt.f32 %v1161_v30  ;;  %vm1168_vm14 = vweird.f32 %v1161_v30 }
0x106b   : > { %v1530_v31 = vpop.eup %1529 }
0x106c   : > { %v1163_v33 = vmul.f32 %v1530_v31, %v1161_v30  ;;  %vm1169_vm13 = vweird.f32 %v1530_v31 }
0x106d   : > { %vm1170_vm15 = vmor %vm1168_vm14, %vm1169_vm13 }
0x106e   : > { %v1164_v34 = vmul.f32 %v1530_v31, %v1163_v33 }
0x1070   : > { %v1165_v35 = vmul.f32 0.5, %v1164_v34 }
0x1072   : > { %v1166_v36 = vsub.f32 1.5, %v1165_v35 }
0x1074   : > { %v1167_v37 = vmul.f32 %v1530_v31, %v1166_v36 }
0x1076   : > { %v1171_v39 = vsel %vm1170_vm15, %v1530_v31, %v1167_v37 }
0x1077   : > { %v1172_v40 = vmul.f32 %v1171_v39, %v1155_v22 }
0x1079   : > { %v1174_v43 = vmul.f32 %v1480_v38, %v1172_v40 }
0x107b   : > { %v1176_v44 = vadd.f32 %v1481_v42, %v1174_v43 }
0x107d   : > { %1409 = vmatmul.msk.f32.vlgmr.msrb.gmra.mxu1 %vm172_vm0, %v1176_v44 }
0x10fa   : > { %v1198_v54 = vpop.f32.mrf.mxu1 }
0x10fb   : > { %v1199_v55 = vadd.f32 %v1482_v53, %v1198_v54 }
0x10fd   : > { %v1202_v56 = vmul.f32 0.044715, %v1199_v55  ;;  %v1201_v60 = vmul.f32 0.5, %v1199_v55 }
0x10ff   : > { %v1203_v41 = vmul.f32 %v1202_v56, %v1199_v55 }
0x1101   : > { %v1204_v57 = vmul.f32 %v1203_v41, %v1199_v55 }
0x1103   : > { %v1205_v58 = vadd.f32 %v1204_v57, %v1199_v55 }
0x1105   : > { %v1206_v59 = vmul.f32 0.7978846, %v1205_v58 }
0x1107   : > { %1531 = vtanh.f32 %v1206_v59 }
0x110d   : > { %v1532_v32 = vpop.eup %1531 }
0x110e   : > { %v1208_v61 = vadd.f32 1.0, %v1532_v32 }
0x1110   : > { %v1209_v62 = vmul.f32 %v1208_v61, %v1201_v60 }
0x1112   : > { %1410 = vmatmul.msk.f32.vlgmr.msrb.gmra.mxu3 %vm684_vm9, %v1209_v62 }
0x1195   : > { %v1231_v1 = vpop.f32.mrf.mxu3 }
0x1196   : > { %v1232_v3 = vadd.f32 %v1483_v0, %v1231_v1 }
0x1198   : > { %v1234_v4 = vadd.f32 %v1232_v3, %v1176_v44 }
0x119a   : > { %v1235_v5 = vsel %vm172_vm0, %v1234_v4, 0.0 }
0x119b   : > { %1236 = vadd.xlane.f32.xlu1 %v1235_v5 }
0x120e   : > { %v1237_v6 = vpop.xlane.xlu1 %1236 }
0x120f   : > { %v1238_v7 = vmul.f32 %v1237_v6, %v1688_v8 }
0x1211   : > { %v1239_v2 = vsub.f32 %v1234_v4, %v1238_v7 }
0x1213   : > { %v1240_v9 = vmul.f32 %v1239_v2, %v1239_v2 }
0x1215   : > { %v1241_v10 = vsel %vm172_vm0, %v1240_v9, 0.0 }
0x1216   : > { %1242 = vadd.xlane.f32.xlu0 %v1241_v10 }
0x1289   : > { %v1243_v15 = vpop.xlane.xlu0 %1242 }
0x128a   : > { %v1244_v16 = vmul.f32 %v1243_v15, %v1688_v8  ;;  %v1485_v8 = vld [vmem:[%s2059_s2 + $0x11] ss:$0 sm:$0xff] }
0x128c   : > { %v1245_v17 = vadd.f32 1e-12, %v1244_v16 }
0x128e   : > { %1533 = vrsqrt.f32 %v1245_v17  ;;  %vm1252_vm2 = vweird.f32 %v1245_v17 }
0x1294   : > { %v1534_v18 = vpop.eup %1533 }
0x1295   : > { %v1247_v19 = vmul.f32 %v1534_v18, %v1245_v17  ;;  %vm1253_vm1 = vweird.f32 %v1534_v18 }
0x1296   : > { %vm1254_vm3 = vmor %vm1252_vm2, %vm1253_vm1 }
0x1297   : > { %v1248_v20 = vmul.f32 %v1534_v18, %v1247_v19 }
0x1299   : > { %v1249_v21 = vmul.f32 0.5, %v1248_v20 }
0x129b   : > { %v1250_v22 = vsub.f32 1.5, %v1249_v21 }
0x129d   : > { %v1251_v23 = vmul.f32 %v1534_v18, %v1250_v22 }
0x129f   : > { %v1255_v25 = vsel %vm1254_vm3, %v1534_v18, %v1251_v23 }
0x12a0   : > { %v1256_v63 = vmul.f32 %v1255_v25, %v1239_v2 }
0x12a2   : > { %v1258_v26 = vmul.f32 %v1484_v24, %v1256_v63 }
0x12a4   : > { %v1260_v27 = vadd.f32 %v1485_v8, %v1258_v26 }
0x12a6   : > { %1411 = vmatmul.msk.f32.vlgmr.msrb.gmra.mxu0 %vm172_vm0, %v1260_v27 }
0x1323   : > { %v1287_v29 = vpop.f32.mrf.mxu0 }
0x1324   : > { %v1288_v30 = vadd.f32 %v1486_v28, %v1287_v29 }
0x1326   : > { %1290 = vst [vmem:[%s163_s8] sm:$0xff] %v1288_v30 }
0x1327   : > { %1562 = shalt.err (!%p1559_p3)
}
0x1328   : > { %1417 = dma.vmem_to_hbm [thread:$0]  (%p1669_p5), %s1305_s9, 128, %s1307_s20, %s1292_s24  }
0x1329 PF: > { %p1423_p4 = scmp.ge.s32.totalorder %s1597_s15, 2  ;;  %s1318_s29 = sand.u32 1, %s1585_s12  }
0x132a   : > { %s1319_s5 = scalar_lea.sflag [#allocation3], %s1318_s29 }
0x132b   : > { %p1420_p7 = pnand %p1423_p4, %p1673_p6 }
0x132d   : > { %p1421_p8 = pneg %p1420_p7 }
0x132f   : > { %1580 = dma.done.wait (%p1421_p8), %s1319_s5, 128  }
0x1330   : > { %1582 = vsyncadd (%p1421_p8), %s1319_s5, 4294967168  ;;  %p13_p9 = scmp.ge.s32.totalorder %s1656_s18, 4   ;;  %s2069_s12 = smov %s1589_s13 }
0x1331   : > { %s2070_s13 = smov %s1593_s14  ;;  %s2071_s14 = smov %s1667_s21 }
0x1332   : > { %s2072_s15 = smov %s1656_s18  ;;  %15 = sbr.rel (!%p13_p9) target bundleno = 3 (0x3), region = 67 }
0x1337   :  { %1325 = vsyncpa [#allocation3], 1 }
0x1338   :  { %1327 = vsyncpa [#allocation3 + $0x1], 1 }

</bundles_post_ra>
